<compile_context>
chip_gen: v7x
topology: tpu7x:2x2x1
jax: 0.10.0
libtpu: 0.0.40
codegen_flags: <defaults>
</compile_context>

<pallas_src>
import jax
import jax.numpy as jnp
from jax import lax
from jax.experimental import pallas as pl
from jax.experimental.pallas import tpu as pltpu


def _round_up(x, m):
    return ((x + m - 1) // m) * m


# -----------------------------------------------------------------------------
# Pallas kernel 1: channel-major 1x1 conv   y[n] = W @ x[n] + b
#   x:(N,Cin,HW)  W:(Cout,Cin)  b:(Cout,1)  ->  y:(N,Cout,HW)
# Lane axis = HW (dense loads/stores); matmul runs bf16 x bf16 -> f32 on the MXU.
# -----------------------------------------------------------------------------
def _conv1x1_kernel(x_ref, w_ref, b_ref, o_ref):
    x = x_ref[...].astype(jnp.bfloat16)        # (Cin, hw_t)
    w = w_ref[...]                             # (Cout, Cin) bf16
    y = lax.dot_general(w, x, (((1,), (0,)), ((), ())),
                        preferred_element_type=jnp.float32)
    o_ref[...] = (y + b_ref[...]).astype(o_ref.dtype)


def _pick_hw_tile(hw, cin, cout, budget=8 << 20):
    # Both convs are HBM-bandwidth bound; pick the largest 128-multiple tile
    # that keeps the double-buffered in+out blocks within `budget` so the
    # ~0.35us per-grid-step overhead is amortized.
    for cand in (16384, 8192, 4096, 2048, 1024, 512, 256, 128):
        if hw % cand == 0 and 2 * (cin + cout) * cand * 4 <= budget:
            return cand
    return hw  # full-dim block is always legal


def conv1x1_channel_major(x_flat, w, b, out_dtype):
    """x:(N,Cin,HW), w:(Cout,Cin), b:(Cout,) -> (N,Cout,HW) with y[n]=w@x[n]+b."""
    N, cin, HW = x_flat.shape
    cout = w.shape[0]
    hw_t = _pick_hw_tile(HW, cin, cout)
    w_b = w.astype(jnp.bfloat16)
    b_c = b.reshape(cout, 1).astype(jnp.float32)
    return pl.pallas_call(
        _conv1x1_kernel,
        out_shape=jax.ShapeDtypeStruct((N, cout, HW), out_dtype),
        grid_spec=pltpu.PrefetchScalarGridSpec(
            num_scalar_prefetch=0,
            grid=(N, HW // hw_t),
            in_specs=[pl.BlockSpec((None, cin, hw_t), lambda n, h: (n, 0, h)),
                      pl.BlockSpec((cout, cin), lambda n, h: (0, 0)),
                      pl.BlockSpec((cout, 1), lambda n, h: (0, 0))],
            out_specs=pl.BlockSpec((None, cout, hw_t), lambda n, h: (n, 0, h))),
        compiler_params=pltpu.CompilerParams(
            dimension_semantics=("parallel", "parallel")),
    )(x_flat, w_b, b_c)


# -----------------------------------------------------------------------------
# Pallas kernel 2: Nystrom attention core, Bblk batch elements per grid step.
# Input is the full (Bblk, HW, 3E) qkv slab (bf16); q/k/v are sliced in VMEM.
# -----------------------------------------------------------------------------
def _make_nystrom_kernel(E, L, HW, n_iter=6):
    chunk = HW // L
    inv_pool = 1.0 / (chunk * (HW ** 0.5))

    def kernel(qkv_ref, o_ref):
        f32, bf16 = jnp.float32, jnp.bfloat16
        slab = qkv_ref[...]                      # (B, HW, 3E) bf16
        B = slab.shape[0]
        q = slab[:, :, :E]                       # in-VMEM lane slices (no HBM copy)
        k = slab[:, :, E:2 * E]
        v = slab[:, :, 2 * E:]

        def bmm(a, b):                           # (B,i,j)@(B,j,k), f32 accumulate
            return jnp.einsum('bij,bjk->bik', a, b, preferred_element_type=f32)

        # ---- landmark pooling: chunk-sum reduce (VPU/XLU), f32 accumulate ---
        def pool(x):
            xs = x.reshape(B, L, chunk, E).astype(f32)
            return jnp.sum(xs, axis=2) * inv_pool          # (B, L, E) f32

        q_l = pool(q)
        k_l = pool(k)
        q_lb = q_l.astype(bf16)
        k_lb = k_l.astype(bf16)

        # ---- k1^T: softmax over HW (lane axis); exp factors kept in bf16 ----
        s1t = jnp.einsum('ble,bhe->blh', k_lb, q, preferred_element_type=f32)
        p1 = jnp.exp(s1t - jnp.max(s1t, axis=-1, keepdims=True)).astype(bf16)
        r1 = pl.reciprocal(jnp.sum(p1, axis=-1, keepdims=True, dtype=f32),
                           approx=True)                    # (B, L, 1) f32

        # ---- k3: softmax over the (tiny) landmark axis -----------------------
        s3 = jnp.einsum('ble,bhe->blh', q_lb, k, preferred_element_type=f32)
        p3 = jnp.exp(s3 - jnp.max(s3, axis=-2, keepdims=True))
        r3 = pl.reciprocal(jnp.sum(p3, axis=-2, keepdims=True), approx=True)
        k3 = (p3 * r3).astype(bf16)                        # (B, L, HW) bf16

        # ---- k2 / k2^T from the tiny landmark scores: exact softmax, no
        #      identity matmul and no in-kernel transpose -----------------------
        def softmax_exact(x, axis):
            e = jnp.exp(x - jnp.max(x, axis=axis, keepdims=True))
            return e / jnp.sum(e, axis=axis, keepdims=True)

        s2 = jnp.einsum('bie,bje->bij', q_l, k_l, preferred_element_type=f32)
        s2t = jnp.einsum('bie,bje->bij', k_l, q_l, preferred_element_type=f32)
        K = softmax_exact(s2, axis=-2)                     # (B, L, L) f32
        KT = softmax_exact(s2t, axis=-1)                   # == K^T

        # ---- Newton-Schulz iterative pseudo-inverse (all float32) -----------
        eye = (lax.broadcasted_iota(jnp.int32, (L, L), 0) ==
               lax.broadcasted_iota(jnp.int32, (L, L), 1)).astype(f32)
        I13, I15, I7 = 13.0 * eye, 15.0 * eye, 7.0 * eye   # hoisted constants
        KA = jnp.abs(K)
        V0 = jnp.max(jnp.sum(KA, axis=-2, keepdims=True), axis=-1, keepdims=True)
        VI = jnp.max(jnp.sum(KA, axis=-1, keepdims=True), axis=-2, keepdims=True)
        Vinv = KT / (V0 * VI)
        for _ in range(n_iter):
            KV = bmm(K, Vinv)
            Vinv = bmm(0.25 * Vinv, I13 - bmm(KV, I15 - bmm(KV, I7 - KV)))

        # ---- re-associated output chain: out = k1 @ (Vinv @ (k3 @ v)) + v ---
        # k1's row reciprocal is folded into the tiny (B, L, E) factor.
        k3v = jnp.einsum('blh,bhe->ble', k3, v, preferred_element_type=f32)
        tvk = (bmm(Vinv, k3v) * r1).astype(bf16)           # (B, L, E)
        out = jnp.einsum('blh,ble->bhe', p1, tvk,
                         preferred_element_type=f32)       # (B, HW, E)
        # TODO(synk): with E < 128 this store is lane-masked; packing the output
        # into a (HW*E/128, 128) slab in-kernel would make it lane-dense but
        # requires a cross-tile relayout, so it is left as-is.
        o_ref[...] = (out + v.astype(f32)).astype(o_ref.dtype)

    return kernel


def _attention_bytes_per_batch(HW, E, L):
    """Padding-aware per-batch-element VMEM estimate (blocks + temporaries)."""
    e_pad = _round_up(E, 128)
    e3_pad = _round_up(3 * E, 128)
    l_pad = _round_up(L, 16)
    io = 2 * HW * e3_pad * 2 + 2 * HW * e_pad * 2          # double-buffered in/out (bf16)
    tmp = (2 * HW * e_pad * 4                              # out f32, v f32
           + 3 * HW * e_pad * 2                            # q/k/v bf16 lane slices
           + 2 * l_pad * HW * 4                            # s1t, s3 f32
           + 2 * l_pad * HW * 2                            # p1, k3 bf16
           + 8 * l_pad * e_pad * 4                         # landmark vectors
           + 8 * l_pad * l_pad * 4)                        # Newton-Schulz mats
    return io + tmp


def _plan_attention(N, HW, E, L):
    try:
        vmem_cap = int(pltpu.get_tpu_info().vmem_capacity_bytes)
    except Exception:                                      # conservative: v7x-sized VMEM
        vmem_cap = 64 << 20
    small_vmem = vmem_cap <= (64 << 20)
    per_b = _attention_bytes_per_batch(HW, E, L)
    budget = int(0.55 * vmem_cap)
    max_b = max(1, budget // per_b)
    cands = [d for d in range(1, N + 1) if N % d == 0 and d <= max_b] or [1]
    if small_vmem:
        # v7x: 64 MiB VMEM, 2 TensorCores -> prefer an even grid so the
        # parallel batch axis splits evenly across both cores.
        even = [d for d in cands if (N // d) % 2 == 0]
        bblk = max(even) if even else max(cands)
        cap = 48 << 20
    else:
        # v5e / v6e: 128 MiB VMEM, single TensorCore -> grid of 1 is fine,
        # maximize the batch block to amortize per-step overhead.
        bblk = max(cands)
        cap = 100 << 20
    vmem_limit = int(min(max(per_b * bblk + (8 << 20), 32 << 20), cap))
    return bblk, vmem_limit


def nystrom_attention_core(qkv_t, embed_dim, num_landmarks):
    N, HW, E3 = qkv_t.shape
    E, L = embed_dim, num_landmarks
    bblk, vmem_limit = _plan_attention(N, HW, E, L)
    kernel = _make_nystrom_kernel(E, L, HW)
    # TODO(synk): for very large HW (>= ~8K) on v7x the (Bblk, L, HW) scores
    # should be streamed over an inner HW axis with running softmax stats;
    # not implemented here.
    return pl.pallas_call(
        kernel,
        out_shape=jax.ShapeDtypeStruct((N, HW, E), jnp.bfloat16),
        grid_spec=pltpu.PrefetchScalarGridSpec(
            num_scalar_prefetch=0,
            grid=(N // bblk,),
            in_specs=[pl.BlockSpec((bblk, HW, E3), lambda n: (n, 0, 0))],
            out_specs=pl.BlockSpec((bblk, HW, E), lambda n: (n, 0, 0))),
        compiler_params=pltpu.CompilerParams(
            dimension_semantics=("parallel",),
            vmem_limit_bytes=vmem_limit),
    )(qkv_t)


# -----------------------------------------------------------------------------
# Full forward (Pallas kernels + free bitcast-reshape glue)
# -----------------------------------------------------------------------------
def nystrom_attention_forward(x, w_qkv, b_qkv, w_out, b_out,
                              embed_dim, num_landmarks):
    N, C, H, W = x.shape
    HW = H * W
    E, L = embed_dim, num_landmarks
    assert HW % L == 0

    # qkv 1x1 conv, channel-major: (3E,C)@(C,HW) per batch -> (N, 3E, HW) bf16.
    qkv_chw = conv1x1_channel_major(x.reshape(N, C, HW), w_qkv, b_qkv,
                                    jnp.bfloat16)

    # torch: qkv(x).reshape(N, H*W, 3E) -- raw row-major reinterpretation (free).
    # The slab is passed whole; q/k/v are sliced inside the kernel (no HBM copies).
    qkv_t = qkv_chw.reshape(N, HW, 3 * E)

    out = nystrom_attention_core(qkv_t, E, L)                        # (N, HW, E)

    # torch: out.reshape(N, -1, H, W) -- raw reinterpretation (free), then the
    # out 1x1 conv, channel-major: (C,E)@(E,HW) per batch.
    y = conv1x1_channel_major(out.reshape(N, E, HW), w_out, b_out, x.dtype)
    return y.reshape(N, C, H, W)


# -----------------------------------------------------------------------------
# Pure-JAX reference (mirrors the PyTorch forward exactly) for validation
# -----------------------------------------------------------------------------
def reference_forward(x, w_qkv, b_qkv, w_out, b_out, embed_dim, num_landmarks):
    N, C, H, W = x.shape
    HW = H * W
    E, L = embed_dim, num_landmarks
    qkv = jnp.einsum('oc,nchw->nohw', w_qkv, x) + b_qkv[None, :, None, None]
    qkv = qkv.reshape(N, HW, 3 * E)
    q, k, v = qkv[..., :E], qkv[..., E:2 * E], qkv[..., 2 * E:]
    q_l = q.reshape(N, L, HW // L, E).mean(axis=-2) / (HW ** 0.5)
    k_l = k.reshape(N, L, HW // L, E).mean(axis=-2) / (HW ** 0.5)
    sm = lambda a: jax.nn.softmax(a, axis=-2)
    k1 = sm(jnp.einsum('nij,nkj->nik', q, k_l))
    k2 = sm(jnp.einsum('nij,nkj->nik', q_l, k_l))
    k3 = sm(jnp.einsum('nij,nkj->nik', q_l, k))
    I = jnp.eye(L, dtype=x.dtype)
    K = k2
    KA = jnp.abs(K)
    v0 = jnp.max(jnp.sum(KA, axis=-2, keepdims=True), axis=-1, keepdims=True)
    vi = jnp.max(jnp.sum(KA, axis=-1, keepdims=True), axis=-2, keepdims=True)
    V = jnp.swapaxes(K, -1, -2) / (v0 * vi)
    bmm = lambda a, b: jnp.einsum('nij,njk->nik', a, b)
    for _ in range(6):
        KV = bmm(K, V)
        V = bmm(0.25 * V, 13.0 * I - bmm(KV, 15.0 * I - bmm(KV, 7.0 * I - KV)))
    out = bmm(bmm(k1, V), bmm(k3, v)) + v
    out = out.reshape(N, E, H, W)
    return jnp.einsum('oc,nchw->nohw', w_out, out) + b_out[None, :, None, None]


if __name__ == "__main__":
    in_channels, embed_dim, num_landmarks = 4, 32, 8
    N, H, W = 2, 16, 16

    key = jax.random.PRNGKey(0)
    kw1, kb1, kw2, kb2, kx = jax.random.split(key, 5)
    # Conv2d(in_channels, 3*embed_dim, 1) weights  -> (3E, C) matrix + bias
    w_qkv = 0.1 * jax.random.normal(kw1, (3 * embed_dim, in_channels), jnp.float32)
    b_qkv = 0.1 * jax.random.normal(kb1, (3 * embed_dim,), jnp.float32)
    # Conv2d(embed_dim, in_channels, 1) weights    -> (C, E) matrix + bias
    w_out = 0.1 * jax.random.normal(kw2, (in_channels, embed_dim), jnp.float32)
    b_out = 0.1 * jax.random.normal(kb2, (in_channels,), jnp.float32)

    x = jax.random.normal(kx, (N, in_channels, H, W), jnp.float32)

    fwd = jax.jit(lambda xx: nystrom_attention_forward(
        xx, w_qkv, b_qkv, w_out, b_out, embed_dim, num_landmarks))
    y = jax.block_until_ready(fwd(x))

    y_ref = reference_forward(x, w_qkv, b_qkv, w_out, b_out,
                              embed_dim, num_landmarks)
    assert y.shape == (N, in_channels, H, W)
    assert bool(jnp.all(jnp.isfinite(y)))
    err = float(jnp.max(jnp.abs(y - y_ref)))
    assert bool(jnp.allclose(y, y_ref, atol=5e-2, rtol=5e-2)), err
    print("KERNEL_OK")
</pallas_src>

<mosaic_0001>
module attributes {stable_mosaic.version = 11 : i64} {
  func.func @_conv1x1_kernel(%arg0: i32, %arg1: i32, %arg2: memref<1x4x256xf32, #tpu.memory_space<vmem>>, %arg3: memref<96x4xbf16, #tpu.memory_space<vmem>>, %arg4: memref<96x1xf32, #tpu.memory_space<vmem>>, %arg5: memref<1x96x256xbf16, #tpu.memory_space<vmem>>) attributes {dimension_semantics = [#tpu.dimension_semantics<parallel>, #tpu.dimension_semantics<parallel>], iteration_bounds = array<i64: 2, 1>, scalar_prefetch = 0 : i64, scratch_operands = 0 : i64, tpu.core_type = #tpu.core_type<tc>, window_params = [{transform_indices = @transform_0, window_bounds = array<i64: 1, 4, 256>}, {pipeline_mode = #tpu.pipeline_mode<synchronous>, transform_indices = @transform_1, window_bounds = array<i64: 96, 4>}, {pipeline_mode = #tpu.pipeline_mode<synchronous>, transform_indices = @transform_2, window_bounds = array<i64: 96, 1>}, {transform_indices = @transform_3, window_bounds = array<i64: 1, 96, 256>}]} {
    %c0 = arith.constant 0 : index
    %c0_0 = arith.constant 0 : index
    %c0_1 = arith.constant 0 : index
    %0 = vector.load %arg2[%c0, %c0_0, %c0_1] : memref<1x4x256xf32, #tpu.memory_space<vmem>>, vector<1x4x256xf32>
    %1 = vector.shape_cast %0 : vector<1x4x256xf32> to vector<4x256xf32>
    %2 = arith.truncf %1 : vector<4x256xf32> to vector<4x256xbf16>
    %c0_2 = arith.constant 0 : index
    %c0_3 = arith.constant 0 : index
    %3 = vector.load %arg3[%c0_2, %c0_3] : memref<96x4xbf16, #tpu.memory_space<vmem>>, vector<96x4xbf16>
    %cst = arith.constant dense<0.000000e+00> : vector<96x256xf32>
    %4 = tpu.matmul %3, %2, %cst {dimension_numbers = #tpu.dot_dimension_numbers<[1], [0], [0], [1], [0, 0, 1, 1], [], []>} : vector<96x4xbf16>, vector<4x256xbf16>, vector<96x256xf32> -> vector<96x256xf32>
    %c0_4 = arith.constant 0 : index
    %c0_5 = arith.constant 0 : index
    %5 = vector.load %arg4[%c0_4, %c0_5] : memref<96x1xf32, #tpu.memory_space<vmem>>, vector<96x1xf32>
    %6 = vector.broadcast %5 : vector<96x1xf32> to vector<96x256xf32>
    %7 = arith.addf %4, %6 : vector<96x256xf32>
    %8 = arith.truncf %7 : vector<96x256xf32> to vector<96x256xbf16>
    %c0_6 = arith.constant 0 : index
    %c0_7 = arith.constant 0 : index
    %c0_8 = arith.constant 0 : index
    %9 = vector.load %arg5[%c0_6, %c0_7, %c0_8] : memref<1x96x256xbf16, #tpu.memory_space<vmem>>, vector<1x96x256xbf16>
    %10 = vector.shape_cast %9 : vector<1x96x256xbf16> to vector<96x256xbf16>
    %11 = vector.shape_cast %8 : vector<96x256xbf16> to vector<1x96x256xbf16>
    tpu.vector_store %arg5[%c0_6, %c0_7, %c0_8], %11 {strides = array<i32>} : memref<1x96x256xbf16, #tpu.memory_space<vmem>>, vector<1x96x256xbf16>,
    return
  }
  func.func @transform_0(%arg0: i32, %arg1: i32) -> (i32, i32, i32) {
    %c0_i32 = arith.constant 0 : i32
    %c0_i32_0 = arith.constant 0 : i32
    return %arg0, %c0_i32, %arg1 : i32, i32, i32
  }
  func.func @transform_1(%arg0: i32, %arg1: i32) -> (i32, i32) {
    %c0_i32 = arith.constant 0 : i32
    %c0_i32_0 = arith.constant 0 : i32
    %c0_i32_1 = arith.constant 0 : i32
    return %c0_i32, %c0_i32_0 : i32, i32
  }
  func.func @transform_2(%arg0: i32, %arg1: i32) -> (i32, i32) {
    %c0_i32 = arith.constant 0 : i32
    %c0_i32_0 = arith.constant 0 : i32
    %c0_i32_1 = arith.constant 0 : i32
    return %c0_i32, %c0_i32_0 : i32, i32
  }
  func.func @transform_3(%arg0: i32, %arg1: i32) -> (i32, i32, i32) {
    %c0_i32 = arith.constant 0 : i32
    %c0_i32_0 = arith.constant 0 : i32
    return %arg0, %c0_i32, %arg1 : i32, i32, i32
  }
}

module attributes {stable_mosaic.version = 11 : i64} {
  func.func @kernel(%arg0: i32, %arg1: memref<1x256x96xbf16, #tpu.memory_space<vmem>>, %arg2: memref<1x256x32xbf16, #tpu.memory_space<vmem>>) attributes {dimension_semantics = [#tpu.dimension_semantics<parallel>], iteration_bounds = array<i64: 2>, scalar_prefetch = 0 : i64, scratch_operands = 0 : i64, tpu.core_type = #tpu.core_type<tc>, window_params = [{transform_indices = @transform_0, window_bounds = array<i64: 1, 256, 96>}, {transform_indices = @transform_1, window_bounds = array<i64: 1, 256, 32>}]} {
    %c0 = arith.constant 0 : index
    %c0_0 = arith.constant 0 : index
    %c0_1 = arith.constant 0 : index
    %0 = vector.load %arg1[%c0, %c0_0, %c0_1] : memref<1x256x96xbf16, #tpu.memory_space<vmem>>, vector<1x256x96xbf16>
    %1 = vector.extract_strided_slice %0 {offsets = [0, 0, 0], sizes = [1, 256, 32], strides = [1, 1, 1]} : vector<1x256x96xbf16> to vector<1x256x32xbf16>
    %2 = vector.extract_strided_slice %0 {offsets = [0, 0, 32], sizes = [1, 256, 32], strides = [1, 1, 1]} : vector<1x256x96xbf16> to vector<1x256x32xbf16>
    %3 = vector.extract_strided_slice %0 {offsets = [0, 0, 64], sizes = [1, 256, 32], strides = [1, 1, 1]} : vector<1x256x96xbf16> to vector<1x256x32xbf16>
    %4 = vector.shape_cast %1 : vector<1x256x32xbf16> to vector<1x8x32x32xbf16>
    %5 = arith.extf %4 : vector<1x8x32x32xbf16> to vector<1x8x32x32xf32>
    %cst = arith.constant dense<0.000000e+00> : vector<1x8x32xf32>
    %6 = vector.multi_reduction <add>, %5, %cst [2] : vector<1x8x32x32xf32> to vector<1x8x32xf32>
    %cst_2 = arith.constant 0.001953125 : f32
    %7 = vector.broadcast %cst_2 : f32 to vector<1x8x32xf32>
    %8 = arith.mulf %6, %7 : vector<1x8x32xf32>
    %9 = vector.shape_cast %2 : vector<1x256x32xbf16> to vector<1x8x32x32xbf16>
    %10 = arith.extf %9 : vector<1x8x32x32xbf16> to vector<1x8x32x32xf32>
    %cst_3 = arith.constant dense<0.000000e+00> : vector<1x8x32xf32>
    %11 = vector.multi_reduction <add>, %10, %cst_3 [2] : vector<1x8x32x32xf32> to vector<1x8x32xf32>
    %cst_4 = arith.constant 0.001953125 : f32
    %12 = vector.broadcast %cst_4 : f32 to vector<1x8x32xf32>
    %13 = arith.mulf %11, %12 : vector<1x8x32xf32>
    %14 = arith.truncf %8 : vector<1x8x32xf32> to vector<1x8x32xbf16>
    %15 = arith.truncf %13 : vector<1x8x32xf32> to vector<1x8x32xbf16>
    "tpu.trace_start"() <{level = 10 : i32, message = "ble,bhe->blh"}> : () -> ()
    %cst_5 = arith.constant dense<0.000000e+00> : vector<1x8x256xf32>
    %16 = tpu.matmul %15, %1, %cst_5 {dimension_numbers = #tpu.dot_dimension_numbers<[2], [2], [1], [1], [0, 0, 0, 1, 1, 1], [0], [0]>} : vector<1x8x32xbf16>, vector<1x256x32xbf16>, vector<1x8x256xf32> -> vector<1x8x256xf32>
    "tpu.trace_stop"() : () -> ()
    %cst_6 = arith.constant dense<0xFF800000> : vector<1x8xf32>
    %17 = vector.multi_reduction <maximumf>, %16, %cst_6 [2] : vector<1x8x256xf32> to vector<1x8xf32>
    %18 = vector.shape_cast %17 : vector<1x8xf32> to vector<1x8x1xf32>
    %19 = vector.broadcast %18 : vector<1x8x1xf32> to vector<1x8x256xf32>
    %20 = arith.subf %16, %19 : vector<1x8x256xf32>
    %21 = math.exp %20 : vector<1x8x256xf32>
    %22 = arith.truncf %21 : vector<1x8x256xf32> to vector<1x8x256xbf16>
    %23 = arith.extf %22 : vector<1x8x256xbf16> to vector<1x8x256xf32>
    %cst_7 = arith.constant dense<0.000000e+00> : vector<1x8xf32>
    %24 = vector.multi_reduction <add>, %23, %cst_7 [2] : vector<1x8x256xf32> to vector<1x8xf32>
    %25 = vector.shape_cast %24 : vector<1x8xf32> to vector<1x8x1xf32>
    %26 = tpu.reciprocal %25 {approx = true} : vector<1x8x1xf32> -> vector<1x8x1xf32>
    "tpu.trace_start"() <{level = 10 : i32, message = "ble,bhe->blh"}> : () -> ()
    %cst_8 = arith.constant dense<0.000000e+00> : vector<1x8x256xf32>
    %27 = tpu.matmul %14, %2, %cst_8 {dimension_numbers = #tpu.dot_dimension_numbers<[2], [2], [1], [1], [0, 0, 0, 1, 1, 1], [0], [0]>} : vector<1x8x32xbf16>, vector<1x256x32xbf16>, vector<1x8x256xf32> -> vector<1x8x256xf32>
    "tpu.trace_stop"() : () -> ()
    %cst_9 = arith.constant dense<0xFF800000> : vector<1x256xf32>
    %28 = vector.multi_reduction <maximumf>, %27, %cst_9 [1] : vector<1x8x256xf32> to vector<1x256xf32>
    %29 = vector.shape_cast %28 : vector<1x256xf32> to vector<1x1x256xf32>
    %30 = vector.broadcast %29 : vector<1x1x256xf32> to vector<1x8x256xf32>
    %31 = arith.subf %27, %30 : vector<1x8x256xf32>
    %32 = math.exp %31 : vector<1x8x256xf32>
    %cst_10 = arith.constant dense<0.000000e+00> : vector<1x256xf32>
    %33 = vector.multi_reduction <add>, %32, %cst_10 [1] : vector<1x8x256xf32> to vector<1x256xf32>
    %34 = vector.shape_cast %33 : vector<1x256xf32> to vector<1x1x256xf32>
    %35 = tpu.reciprocal %34 {approx = true} : vector<1x1x256xf32> -> vector<1x1x256xf32>
    %36 = vector.broadcast %35 : vector<1x1x256xf32> to vector<1x8x256xf32>
    %37 = arith.mulf %32, %36 : vector<1x8x256xf32>
    %38 = arith.truncf %37 : vector<1x8x256xf32> to vector<1x8x256xbf16>
    "tpu.trace_start"() <{level = 10 : i32, message = "bie,bje->bij"}> : () -> ()
    %cst_11 = arith.constant dense<0.000000e+00> : vector<1x8x8xf32>
    %39 = tpu.matmul %8, %13, %cst_11 {dimension_numbers = #tpu.dot_dimension_numbers<[2], [2], [1], [1], [0, 0, 0, 1, 1, 1], [0], [0]>} : vector<1x8x32xf32>, vector<1x8x32xf32>, vector<1x8x8xf32> -> vector<1x8x8xf32>
    %cst_12 = arith.constant dense<0.000000e+00> : vector<1x8x8xf32>
    %40 = tpu.matmul %13, %8, %cst_12 {dimension_numbers = #tpu.dot_dimension_numbers<[2], [2], [1], [1], [0, 0, 0, 1, 1, 1], [0], [0]>} : vector<1x8x32xf32>, vector<1x8x32xf32>, vector<1x8x8xf32> -> vector<1x8x8xf32>
    "tpu.trace_stop"() : () -> ()
    %cst_13 = arith.constant dense<0xFF800000> : vector<1x8xf32>
    %41 = vector.multi_reduction <maximumf>, %39, %cst_13 [1] : vector<1x8x8xf32> to vector<1x8xf32>
    %42 = vector.shape_cast %41 : vector<1x8xf32> to vector<1x1x8xf32>
    %43 = vector.broadcast %42 : vector<1x1x8xf32> to vector<1x8x8xf32>
    %44 = arith.subf %39, %43 : vector<1x8x8xf32>
    %45 = math.exp %44 : vector<1x8x8xf32>
    %cst_14 = arith.constant dense<0.000000e+00> : vector<1x8xf32>
    %46 = vector.multi_reduction <add>, %45, %cst_14 [1] : vector<1x8x8xf32> to vector<1x8xf32>
    %47 = vector.shape_cast %46 : vector<1x8xf32> to vector<1x1x8xf32>
    %48 = vector.broadcast %47 : vector<1x1x8xf32> to vector<1x8x8xf32>
    %49 = arith.divf %45, %48 : vector<1x8x8xf32>
    %cst_15 = arith.constant dense<0xFF800000> : vector<1x8xf32>
    %50 = vector.multi_reduction <maximumf>, %40, %cst_15 [2] : vector<1x8x8xf32> to vector<1x8xf32>
    %51 = vector.shape_cast %50 : vector<1x8xf32> to vector<1x8x1xf32>
    %52 = vector.broadcast %51 : vector<1x8x1xf32> to vector<1x8x8xf32>
    %53 = arith.subf %40, %52 : vector<1x8x8xf32>
    %54 = math.exp %53 : vector<1x8x8xf32>
    %cst_16 = arith.constant dense<0.000000e+00> : vector<1x8xf32>
    %55 = vector.multi_reduction <add>, %54, %cst_16 [2] : vector<1x8x8xf32> to vector<1x8xf32>
    %56 = vector.shape_cast %55 : vector<1x8xf32> to vector<1x8x1xf32>
    %57 = vector.broadcast %56 : vector<1x8x1xf32> to vector<1x8x8xf32>
    %58 = arith.divf %54, %57 : vector<1x8x8xf32>
    %59 = tpu.iota {dimensions = array<i32: 0>} : vector<8x8xi32>
    %60 = tpu.iota {dimensions = array<i32: 1>} : vector<8x8xi32>
    %61 = arith.cmpi eq, %59, %60 : vector<8x8xi32>
    %62 = arith.extui %61 : vector<8x8xi1> to vector<8x8xi32>
    %63 = arith.sitofp %62 : vector<8x8xi32> to vector<8x8xf32>
    %cst_17 = arith.constant 1.300000e+01 : f32
    %64 = vector.broadcast %cst_17 : f32 to vector<8x8xf32>
    %65 = arith.mulf %64, %63 : vector<8x8xf32>
    %cst_18 = arith.constant 1.500000e+01 : f32
    %66 = vector.broadcast %cst_18 : f32 to vector<8x8xf32>
    %67 = arith.mulf %66, %63 : vector<8x8xf32>
    %cst_19 = arith.constant 7.000000e+00 : f32
    %68 = vector.broadcast %cst_19 : f32 to vector<8x8xf32>
    %69 = arith.mulf %68, %63 : vector<8x8xf32>
    %70 = math.absf %49 : vector<1x8x8xf32>
    %cst_20 = arith.constant dense<0.000000e+00> : vector<1x8xf32>
    %71 = vector.multi_reduction <add>, %70, %cst_20 [1] : vector<1x8x8xf32> to vector<1x8xf32>
    %72 = vector.shape_cast %71 : vector<1x8xf32> to vector<1x1x8xf32>
    %cst_21 = arith.constant dense<0xFF800000> : vector<1x1xf32>
    %73 = vector.multi_reduction <maximumf>, %72, %cst_21 [2] : vector<1x1x8xf32> to vector<1x1xf32>
    %74 = vector.shape_cast %73 : vector<1x1xf32> to vector<1x1x1xf32>
    %cst_22 = arith.constant dense<0.000000e+00> : vector<1x8xf32>
    %75 = vector.multi_reduction <add>, %70, %cst_22 [2] : vector<1x8x8xf32> to vector<1x8xf32>
    %76 = vector.shape_cast %75 : vector<1x8xf32> to vector<1x8x1xf32>
    %cst_23 = arith.constant dense<0xFF800000> : vector<1x1xf32>
    %77 = vector.multi_reduction <maximumf>, %76, %cst_23 [1] : vector<1x8x1xf32> to vector<1x1xf32>
    %78 = vector.shape_cast %77 : vector<1x1xf32> to vector<1x1x1xf32>
    %79 = arith.mulf %74, %78 : vector<1x1x1xf32>
    %80 = vector.broadcast %79 : vector<1x1x1xf32> to vector<1x8x8xf32>
    %81 = arith.divf %58, %80 : vector<1x8x8xf32>
    "tpu.trace_start"() <{level = 10 : i32, message = "bij,bjk->bik"}> : () -> ()
    %cst_24 = arith.constant dense<0.000000e+00> : vector<1x8x8xf32>
    %82 = tpu.matmul %49, %81, %cst_24 {dimension_numbers = #tpu.dot_dimension_numbers<[2], [1], [1], [2], [0, 0, 0, 1, 1, 2], [0], [0]>} : vector<1x8x8xf32>, vector<1x8x8xf32>, vector<1x8x8xf32> -> vector<1x8x8xf32>
    "tpu.trace_stop"() : () -> ()
    %cst_25 = arith.constant 2.500000e-01 : f32
    %83 = vector.broadcast %cst_25 : f32 to vector<1x8x8xf32>
    %84 = arith.mulf %83, %81 : vector<1x8x8xf32>
    %85 = vector.shape_cast %69 : vector<8x8xf32> to vector<1x8x8xf32>
    %86 = arith.subf %85, %82 : vector<1x8x8xf32>
    "tpu.trace_start"() <{level = 10 : i32, message = "bij,bjk->bik"}> : () -> ()
    %cst_26 = arith.constant dense<0.000000e+00> : vector<1x8x8xf32>
    %87 = tpu.matmul %82, %86, %cst_26 {dimension_numbers = #tpu.dot_dimension_numbers<[2], [1], [1], [2], [0, 0, 0, 1, 1, 2], [0], [0]>} : vector<1x8x8xf32>, vector<1x8x8xf32>, vector<1x8x8xf32> -> vector<1x8x8xf32>
    "tpu.trace_stop"() : () -> ()
    %88 = vector.shape_cast %67 : vector<8x8xf32> to vector<1x8x8xf32>
    %89 = arith.subf %88, %87 : vector<1x8x8xf32>
    "tpu.trace_start"() <{level = 10 : i32, message = "bij,bjk->bik"}> : () -> ()
    %cst_27 = arith.constant dense<0.000000e+00> : vector<1x8x8xf32>
    %90 = tpu.matmul %82, %89, %cst_27 {dimension_numbers = #tpu.dot_dimension_numbers<[2], [1], [1], [2], [0, 0, 0, 1, 1, 2], [0], [0]>} : vector<1x8x8xf32>, vector<1x8x8xf32>, vector<1x8x8xf32> -> vector<1x8x8xf32>
    "tpu.trace_stop"() : () -> ()
    %91 = vector.shape_cast %65 : vector<8x8xf32> to vector<1x8x8xf32>
    %92 = arith.subf %91, %90 : vector<1x8x8xf32>
    "tpu.trace_start"() <{level = 10 : i32, message = "bij,bjk->bik"}> : () -> ()
    %cst_28 = arith.constant dense<0.000000e+00> : vector<1x8x8xf32>
    %93 = tpu.matmul %84, %92, %cst_28 {dimension_numbers = #tpu.dot_dimension_numbers<[2], [1], [1], [2], [0, 0, 0, 1, 1, 2], [0], [0]>} : vector<1x8x8xf32>, vector<1x8x8xf32>, vector<1x8x8xf32> -> vector<1x8x8xf32>
    %cst_29 = arith.constant dense<0.000000e+00> : vector<1x8x8xf32>
    %94 = tpu.matmul %49, %93, %cst_29 {dimension_numbers = #tpu.dot_dimension_numbers<[2], [1], [1], [2], [0, 0, 0, 1, 1, 2], [0], [0]>} : vector<1x8x8xf32>, vector<1x8x8xf32>, vector<1x8x8xf32> -> vector<1x8x8xf32>
    "tpu.trace_stop"() : () -> ()
    %cst_30 = arith.constant 2.500000e-01 : f32
    %95 = vector.broadcast %cst_30 : f32 to vector<1x8x8xf32>
    %96 = arith.mulf %95, %93 : vector<1x8x8xf32>
    %97 = vector.shape_cast %69 : vector<8x8xf32> to vector<1x8x8xf32>
    %98 = arith.subf %97, %94 : vector<1x8x8xf32>
    "tpu.trace_start"() <{level = 10 : i32, message = "bij,bjk->bik"}> : () -> ()
    %cst_31 = arith.constant dense<0.000000e+00> : vector<1x8x8xf32>
    %99 = tpu.matmul %94, %98, %cst_31 {dimension_numbers = #tpu.dot_dimension_numbers<[2], [1], [1], [2], [0, 0, 0, 1, 1, 2], [0], [0]>} : vector<1x8x8xf32>, vector<1x8x8xf32>, vector<1x8x8xf32> -> vector<1x8x8xf32>
    "tpu.trace_stop"() : () -> ()
    %100 = vector.shape_cast %67 : vector<8x8xf32> to vector<1x8x8xf32>
    %101 = arith.subf %100, %99 : vector<1x8x8xf32>
    "tpu.trace_start"() <{level = 10 : i32, message = "bij,bjk->bik"}> : () -> ()
    %cst_32 = arith.constant dense<0.000000e+00> : vector<1x8x8xf32>
    %102 = tpu.matmul %94, %101, %cst_32 {dimension_numbers = #tpu.dot_dimension_numbers<[2], [1], [1], [2], [0, 0, 0, 1, 1, 2], [0], [0]>} : vector<1x8x8xf32>, vector<1x8x8xf32>, vector<1x8x8xf32> -> vector<1x8x8xf32>
    "tpu.trace_stop"() : () -> ()
    %103 = vector.shape_cast %65 : vector<8x8xf32> to vector<1x8x8xf32>
    %104 = arith.subf %103, %102 : vector<1x8x8xf32>
    "tpu.trace_start"() <{level = 10 : i32, message = "bij,bjk->bik"}> : () -> ()
    %cst_33 = arith.constant dense<0.000000e+00> : vector<1x8x8xf32>
    %105 = tpu.matmul %96, %104, %cst_33 {dimension_numbers = #tpu.dot_dimension_numbers<[2], [1], [1], [2], [0, 0, 0, 1, 1, 2], [0], [0]>} : vector<1x8x8xf32>, vector<1x8x8xf32>, vector<1x8x8xf32> -> vector<1x8x8xf32>
    %cst_34 = arith.constant dense<0.000000e+00> : vector<1x8x8xf32>
    %106 = tpu.matmul %49, %105, %cst_34 {dimension_numbers = #tpu.dot_dimension_numbers<[2], [1], [1], [2], [0, 0, 0, 1, 1, 2], [0], [0]>} : vector<1x8x8xf32>, vector<1x8x8xf32>, vector<1x8x8xf32> -> vector<1x8x8xf32>
    "tpu.trace_stop"() : () -> ()
    %cst_35 = arith.constant 2.500000e-01 : f32
    %107 = vector.broadcast %cst_35 : f32 to vector<1x8x8xf32>
    %108 = arith.mulf %107, %105 : vector<1x8x8xf32>
    %109 = vector.shape_cast %69 : vector<8x8xf32> to vector<1x8x8xf32>
    %110 = arith.subf %109, %106 : vector<1x8x8xf32>
    "tpu.trace_start"() <{level = 10 : i32, message = "bij,bjk->bik"}> : () -> ()
    %cst_36 = arith.constant dense<0.000000e+00> : vector<1x8x8xf32>
    %111 = tpu.matmul %106, %110, %cst_36 {dimension_numbers = #tpu.dot_dimension_numbers<[2], [1], [1], [2], [0, 0, 0, 1, 1, 2], [0], [0]>} : vector<1x8x8xf32>, vector<1x8x8xf32>, vector<1x8x8xf32> -> vector<1x8x8xf32>
    "tpu.trace_stop"() : () -> ()
    %112 = vector.shape_cast %67 : vector<8x8xf32> to vector<1x8x8xf32>
    %113 = arith.subf %112, %111 : vector<1x8x8xf32>
    "tpu.trace_start"() <{level = 10 : i32, message = "bij,bjk->bik"}> : () -> ()
    %cst_37 = arith.constant dense<0.000000e+00> : vector<1x8x8xf32>
    %114 = tpu.matmul %106, %113, %cst_37 {dimension_numbers = #tpu.dot_dimension_numbers<[2], [1], [1], [2], [0, 0, 0, 1, 1, 2], [0], [0]>} : vector<1x8x8xf32>, vector<1x8x8xf32>, vector<1x8x8xf32> -> vector<1x8x8xf32>
    "tpu.trace_stop"() : () -> ()
    %115 = vector.shape_cast %65 : vector<8x8xf32> to vector<1x8x8xf32>
    %116 = arith.subf %115, %114 : vector<1x8x8xf32>
    "tpu.trace_start"() <{level = 10 : i32, message = "bij,bjk->bik"}> : () -> ()
    %cst_38 = arith.constant dense<0.000000e+00> : vector<1x8x8xf32>
    %117 = tpu.matmul %108, %116, %cst_38 {dimension_numbers = #tpu.dot_dimension_numbers<[2], [1], [1], [2], [0, 0, 0, 1, 1, 2], [0], [0]>} : vector<1x8x8xf32>, vector<1x8x8xf32>, vector<1x8x8xf32> -> vector<1x8x8xf32>
    %cst_39 = arith.constant dense<0.000000e+00> : vector<1x8x8xf32>
    %118 = tpu.matmul %49, %117, %cst_39 {dimension_numbers = #tpu.dot_dimension_numbers<[2], [1], [1], [2], [0, 0, 0, 1, 1, 2], [0], [0]>} : vector<1x8x8xf32>, vector<1x8x8xf32>, vector<1x8x8xf32> -> vector<1x8x8xf32>
    "tpu.trace_stop"() : () -> ()
    %cst_40 = arith.constant 2.500000e-01 : f32
    %119 = vector.broadcast %cst_40 : f32 to vector<1x8x8xf32>
    %120 = arith.mulf %119, %117 : vector<1x8x8xf32>
    %121 = vector.shape_cast %69 : vector<8x8xf32> to vector<1x8x8xf32>
    %122 = arith.subf %121, %118 : vector<1x8x8xf32>
    "tpu.trace_start"() <{level = 10 : i32, message = "bij,bjk->bik"}> : () -> ()
    %cst_41 = arith.constant dense<0.000000e+00> : vector<1x8x8xf32>
    %123 = tpu.matmul %118, %122, %cst_41 {dimension_numbers = #tpu.dot_dimension_numbers<[2], [1], [1], [2], [0, 0, 0, 1, 1, 2], [0], [0]>} : vector<1x8x8xf32>, vector<1x8x8xf32>, vector<1x8x8xf32> -> vector<1x8x8xf32>
    "tpu.trace_stop"() : () -> ()
    %124 = vector.shape_cast %67 : vector<8x8xf32> to vector<1x8x8xf32>
    %125 = arith.subf %124, %123 : vector<1x8x8xf32>
    "tpu.trace_start"() <{level = 10 : i32, message = "bij,bjk->bik"}> : () -> ()
    %cst_42 = arith.constant dense<0.000000e+00> : vector<1x8x8xf32>
    %126 = tpu.matmul %118, %125, %cst_42 {dimension_numbers = #tpu.dot_dimension_numbers<[2], [1], [1], [2], [0, 0, 0, 1, 1, 2], [0], [0]>} : vector<1x8x8xf32>, vector<1x8x8xf32>, vector<1x8x8xf32> -> vector<1x8x8xf32>
    "tpu.trace_stop"() : () -> ()
    %127 = vector.shape_cast %65 : vector<8x8xf32> to vector<1x8x8xf32>
    %128 = arith.subf %127, %126 : vector<1x8x8xf32>
    "tpu.trace_start"() <{level = 10 : i32, message = "bij,bjk->bik"}> : () -> ()
    %cst_43 = arith.constant dense<0.000000e+00> : vector<1x8x8xf32>
    %129 = tpu.matmul %120, %128, %cst_43 {dimension_numbers = #tpu.dot_dimension_numbers<[2], [1], [1], [2], [0, 0, 0, 1, 1, 2], [0], [0]>} : vector<1x8x8xf32>, vector<1x8x8xf32>, vector<1x8x8xf32> -> vector<1x8x8xf32>
    %cst_44 = arith.constant dense<0.000000e+00> : vector<1x8x8xf32>
    %130 = tpu.matmul %49, %129, %cst_44 {dimension_numbers = #tpu.dot_dimension_numbers<[2], [1], [1], [2], [0, 0, 0, 1, 1, 2], [0], [0]>} : vector<1x8x8xf32>, vector<1x8x8xf32>, vector<1x8x8xf32> -> vector<1x8x8xf32>
    "tpu.trace_stop"() : () -> ()
    %cst_45 = arith.constant 2.500000e-01 : f32
    %131 = vector.broadcast %cst_45 : f32 to vector<1x8x8xf32>
    %132 = arith.mulf %131, %129 : vector<1x8x8xf32>
    %133 = vector.shape_cast %69 : vector<8x8xf32> to vector<1x8x8xf32>
    %134 = arith.subf %133, %130 : vector<1x8x8xf32>
    "tpu.trace_start"() <{level = 10 : i32, message = "bij,bjk->bik"}> : () -> ()
    %cst_46 = arith.constant dense<0.000000e+00> : vector<1x8x8xf32>
    %135 = tpu.matmul %130, %134, %cst_46 {dimension_numbers = #tpu.dot_dimension_numbers<[2], [1], [1], [2], [0, 0, 0, 1, 1, 2], [0], [0]>} : vector<1x8x8xf32>, vector<1x8x8xf32>, vector<1x8x8xf32> -> vector<1x8x8xf32>
    "tpu.trace_stop"() : () -> ()
    %136 = vector.shape_cast %67 : vector<8x8xf32> to vector<1x8x8xf32>
    %137 = arith.subf %136, %135 : vector<1x8x8xf32>
    "tpu.trace_start"() <{level = 10 : i32, message = "bij,bjk->bik"}> : () -> ()
    %cst_47 = arith.constant dense<0.000000e+00> : vector<1x8x8xf32>
    %138 = tpu.matmul %130, %137, %cst_47 {dimension_numbers = #tpu.dot_dimension_numbers<[2], [1], [1], [2], [0, 0, 0, 1, 1, 2], [0], [0]>} : vector<1x8x8xf32>, vector<1x8x8xf32>, vector<1x8x8xf32> -> vector<1x8x8xf32>
    "tpu.trace_stop"() : () -> ()
    %139 = vector.shape_cast %65 : vector<8x8xf32> to vector<1x8x8xf32>
    %140 = arith.subf %139, %138 : vector<1x8x8xf32>
    "tpu.trace_start"() <{level = 10 : i32, message = "bij,bjk->bik"}> : () -> ()
    %cst_48 = arith.constant dense<0.000000e+00> : vector<1x8x8xf32>
    %141 = tpu.matmul %132, %140, %cst_48 {dimension_numbers = #tpu.dot_dimension_numbers<[2], [1], [1], [2], [0, 0, 0, 1, 1, 2], [0], [0]>} : vector<1x8x8xf32>, vector<1x8x8xf32>, vector<1x8x8xf32> -> vector<1x8x8xf32>
    %cst_49 = arith.constant dense<0.000000e+00> : vector<1x8x8xf32>
    %142 = tpu.matmul %49, %141, %cst_49 {dimension_numbers = #tpu.dot_dimension_numbers<[2], [1], [1], [2], [0, 0, 0, 1, 1, 2], [0], [0]>} : vector<1x8x8xf32>, vector<1x8x8xf32>, vector<1x8x8xf32> -> vector<1x8x8xf32>
    "tpu.trace_stop"() : () -> ()
    %cst_50 = arith.constant 2.500000e-01 : f32
    %143 = vector.broadcast %cst_50 : f32 to vector<1x8x8xf32>
    %144 = arith.mulf %143, %141 : vector<1x8x8xf32>
    %145 = vector.shape_cast %69 : vector<8x8xf32> to vector<1x8x8xf32>
    %146 = arith.subf %145, %142 : vector<1x8x8xf32>
    "tpu.trace_start"() <{level = 10 : i32, message = "bij,bjk->bik"}> : () -> ()
    %cst_51 = arith.constant dense<0.000000e+00> : vector<1x8x8xf32>
    %147 = tpu.matmul %142, %146, %cst_51 {dimension_numbers = #tpu.dot_dimension_numbers<[2], [1], [1], [2], [0, 0, 0, 1, 1, 2], [0], [0]>} : vector<1x8x8xf32>, vector<1x8x8xf32>, vector<1x8x8xf32> -> vector<1x8x8xf32>
    "tpu.trace_stop"() : () -> ()
    %148 = vector.shape_cast %67 : vector<8x8xf32> to vector<1x8x8xf32>
    %149 = arith.subf %148, %147 : vector<1x8x8xf32>
    "tpu.trace_start"() <{level = 10 : i32, message = "bij,bjk->bik"}> : () -> ()
    %cst_52 = arith.constant dense<0.000000e+00> : vector<1x8x8xf32>
    %150 = tpu.matmul %142, %149, %cst_52 {dimension_numbers = #tpu.dot_dimension_numbers<[2], [1], [1], [2], [0, 0, 0, 1, 1, 2], [0], [0]>} : vector<1x8x8xf32>, vector<1x8x8xf32>, vector<1x8x8xf32> -> vector<1x8x8xf32>
    "tpu.trace_stop"() : () -> ()
    %151 = vector.shape_cast %65 : vector<8x8xf32> to vector<1x8x8xf32>
    %152 = arith.subf %151, %150 : vector<1x8x8xf32>
    "tpu.trace_start"() <{level = 10 : i32, message = "bij,bjk->bik"}> : () -> ()
    %cst_53 = arith.constant dense<0.000000e+00> : vector<1x8x8xf32>
    %153 = tpu.matmul %144, %152, %cst_53 {dimension_numbers = #tpu.dot_dimension_numbers<[2], [1], [1], [2], [0, 0, 0, 1, 1, 2], [0], [0]>} : vector<1x8x8xf32>, vector<1x8x8xf32>, vector<1x8x8xf32> -> vector<1x8x8xf32>
    "tpu.trace_stop"() : () -> ()
    "tpu.trace_start"() <{level = 10 : i32, message = "blh,bhe->ble"}> : () -> ()
    %cst_54 = arith.constant dense<0.000000e+00> : vector<1x8x32xf32>
    %154 = tpu.matmul %38, %3, %cst_54 {dimension_numbers = #tpu.dot_dimension_numbers<[2], [1], [1], [2], [0, 0, 0, 1, 1, 2], [0], [0]>} : vector<1x8x256xbf16>, vector<1x256x32xbf16>, vector<1x8x32xf32> -> vector<1x8x32xf32>
    "tpu.trace_stop"() : () -> ()
    "tpu.trace_start"() <{level = 10 : i32, message = "bij,bjk->bik"}> : () -> ()
    %cst_55 = arith.constant dense<0.000000e+00> : vector<1x8x32xf32>
    %155 = tpu.matmul %153, %154, %cst_55 {dimension_numbers = #tpu.dot_dimension_numbers<[2], [1], [1], [2], [0, 0, 0, 1, 1, 2], [0], [0]>} : vector<1x8x8xf32>, vector<1x8x32xf32>, vector<1x8x32xf32> -> vector<1x8x32xf32>
    "tpu.trace_stop"() : () -> ()
    %156 = vector.broadcast %26 : vector<1x8x1xf32> to vector<1x8x32xf32>
    %157 = arith.mulf %155, %156 : vector<1x8x32xf32>
    %158 = arith.truncf %157 : vector<1x8x32xf32> to vector<1x8x32xbf16>
    "tpu.trace_start"() <{level = 10 : i32, message = "blh,ble->bhe"}> : () -> ()
    %cst_56 = arith.constant dense<0.000000e+00> : vector<1x256x32xf32>
    %159 = tpu.matmul %22, %158, %cst_56 {dimension_numbers = #tpu.dot_dimension_numbers<[1], [1], [2], [2], [0, 0, 0, 2, 1, 2], [0], [0]>} : vector<1x8x256xbf16>, vector<1x8x32xbf16>, vector<1x256x32xf32> -> vector<1x256x32xf32>
    "tpu.trace_stop"() : () -> ()
    %160 = arith.extf %3 : vector<1x256x32xbf16> to vector<1x256x32xf32>
    %161 = arith.addf %159, %160 : vector<1x256x32xf32>
    %162 = arith.truncf %161 : vector<1x256x32xf32> to vector<1x256x32xbf16>
    %c0_57 = arith.constant 0 : index
    %c0_58 = arith.constant 0 : index
    %c0_59 = arith.constant 0 : index
    %163 = vector.load %arg2[%c0_57, %c0_58, %c0_59] : memref<1x256x32xbf16, #tpu.memory_space<vmem>>, vector<1x256x32xbf16>
    tpu.vector_store %arg2[%c0_57, %c0_58, %c0_59], %162 {strides = array<i32>} : memref<1x256x32xbf16, #tpu.memory_space<vmem>>, vector<1x256x32xbf16>,
    return
  }
  func.func @transform_0(%arg0: i32) -> (i32, i32, i32) {
    %c0_i32 = arith.constant 0 : i32
    %c0_i32_0 = arith.constant 0 : i32
    %c0_i32_1 = arith.constant 0 : i32
    return %arg0, %c0_i32, %c0_i32_0 : i32, i32, i32
  }
  func.func @transform_1(%arg0: i32) -> (i32, i32, i32) {
    %c0_i32 = arith.constant 0 : i32
    %c0_i32_0 = arith.constant 0 : i32
    %c0_i32_1 = arith.constant 0 : i32
    return %arg0, %c0_i32, %c0_i32_0 : i32, i32, i32
  }
}

module attributes {stable_mosaic.version = 11 : i64} {
  func.func @_conv1x1_kernel(%arg0: i32, %arg1: i32, %arg2: memref<1x32x256xbf16, #tpu.memory_space<vmem>>, %arg3: memref<4x32xbf16, #tpu.memory_space<vmem>>, %arg4: memref<4x1xf32, #tpu.memory_space<vmem>>, %arg5: memref<1x4x256xf32, #tpu.memory_space<vmem>>) attributes {dimension_semantics = [#tpu.dimension_semantics<parallel>, #tpu.dimension_semantics<parallel>], iteration_bounds = array<i64: 2, 1>, scalar_prefetch = 0 : i64, scratch_operands = 0 : i64, tpu.core_type = #tpu.core_type<tc>, window_params = [{transform_indices = @transform_0, window_bounds = array<i64: 1, 32, 256>}, {pipeline_mode = #tpu.pipeline_mode<synchronous>, transform_indices = @transform_1, window_bounds = array<i64: 4, 32>}, {pipeline_mode = #tpu.pipeline_mode<synchronous>, transform_indices = @transform_2, window_bounds = array<i64: 4, 1>}, {transform_indices = @transform_3, window_bounds = array<i64: 1, 4, 256>}]} {
    %c0 = arith.constant 0 : index
    %c0_0 = arith.constant 0 : index
    %c0_1 = arith.constant 0 : index
    %0 = vector.load %arg2[%c0, %c0_0, %c0_1] : memref<1x32x256xbf16, #tpu.memory_space<vmem>>, vector<1x32x256xbf16>
    %1 = vector.shape_cast %0 : vector<1x32x256xbf16> to vector<32x256xbf16>
    %c0_2 = arith.constant 0 : index
    %c0_3 = arith.constant 0 : index
    %2 = vector.load %arg3[%c0_2, %c0_3] : memref<4x32xbf16, #tpu.memory_space<vmem>>, vector<4x32xbf16>
    %cst = arith.constant dense<0.000000e+00> : vector<4x256xf32>
    %3 = tpu.matmul %2, %1, %cst {dimension_numbers = #tpu.dot_dimension_numbers<[1], [0], [0], [1], [0, 0, 1, 1], [], []>} : vector<4x32xbf16>, vector<32x256xbf16>, vector<4x256xf32> -> vector<4x256xf32>
    %c0_4 = arith.constant 0 : index
    %c0_5 = arith.constant 0 : index
    %4 = vector.load %arg4[%c0_4, %c0_5] : memref<4x1xf32, #tpu.memory_space<vmem>>, vector<4x1xf32>
    %5 = vector.broadcast %4 : vector<4x1xf32> to vector<4x256xf32>
    %6 = arith.addf %3, %5 : vector<4x256xf32>
    %c0_6 = arith.constant 0 : index
    %c0_7 = arith.constant 0 : index
    %c0_8 = arith.constant 0 : index
    %7 = vector.load %arg5[%c0_6, %c0_7, %c0_8] : memref<1x4x256xf32, #tpu.memory_space<vmem>>, vector<1x4x256xf32>
    %8 = vector.shape_cast %7 : vector<1x4x256xf32> to vector<4x256xf32>
    %9 = vector.shape_cast %6 : vector<4x256xf32> to vector<1x4x256xf32>
    tpu.vector_store %arg5[%c0_6, %c0_7, %c0_8], %9 {strides = array<i32>} : memref<1x4x256xf32, #tpu.memory_space<vmem>>, vector<1x4x256xf32>,
    return
  }
  func.func @transform_0(%arg0: i32, %arg1: i32) -> (i32, i32, i32) {
    %c0_i32 = arith.constant 0 : i32
    %c0_i32_0 = arith.constant 0 : i32
    return %arg0, %c0_i32, %arg1 : i32, i32, i32
  }
  func.func @transform_1(%arg0: i32, %arg1: i32) -> (i32, i32) {
    %c0_i32 = arith.constant 0 : i32
    %c0_i32_0 = arith.constant 0 : i32
    %c0_i32_1 = arith.constant 0 : i32
    return %c0_i32, %c0_i32_0 : i32, i32
  }
  func.func @transform_2(%arg0: i32, %arg1: i32) -> (i32, i32) {
    %c0_i32 = arith.constant 0 : i32
    %c0_i32_0 = arith.constant 0 : i32
    %c0_i32_1 = arith.constant 0 : i32
    return %c0_i32, %c0_i32_0 : i32, i32
  }
  func.func @transform_3(%arg0: i32, %arg1: i32) -> (i32, i32, i32) {
    %c0_i32 = arith.constant 0 : i32
    %c0_i32_0 = arith.constant 0 : i32
    return %arg0, %c0_i32, %arg1 : i32, i32, i32
  }
}

</mosaic_0001>

<bundles_post_ra>
// kernel: _lambda_.3
= control target key start
LH: loop header
LB: loop body
LE: loop exit
PB: predicated region body
PF: predicated region fallthrough
CT: control target
= control target key end

     0   :  { %s751_s12 = smov 0   ;;  %s753_s13 = smov 0   ;;  %s870_s0 = inlined_call_operand.vmem [shape: f32[2,4,256], index: 0, kind: input, shape index: {}]   ;;  %s871_s1 = inlined_call_operand.vmem [shape: bf16[96,4], index: 1, kind: input, shape index: {}]   ;;  %s872_s2 = inlined_call_operand.vmem [shape: f32[96,1], index: 2, kind: input, shape index: {}]   ;;  %s873_s3 = inlined_call_operand.vmem [shape: bf16[2,96,256], index: 3, kind: output, shape index: {}]  }
   0x1   :  { %s755_s14 = smov 0  }
   0x2 LB: > { %s25_s15 = sadd.s32 1, %s724_s13  ;;  %p625_p0 = scmp.ge.s32.totalorder %s728_s14, 1  ;;  %s728_s14 = sphi %s755_s14, %s13_s14   ;;  %s724_s13 = sphi %s753_s13, %s875_s13   ;;  %s720_s12 = sphi %s751_s12, %s874_s12  }
   0x3   : > { %p27_p1 = scmp.ge.s32.totalorder %s25_s15, 2  ;;  %p158_p2 = scmp.lt.s32.totalorder %s728_s14, 3 }
   0x5   : > { %s877_s15 = smov (%p27_p1, %s25_s15), 0  ;;  %p159_p3 = pnand %p625_p0, %p158_p2 }
   0x6   : > { %p191_p4 = scmp.lt.s32.totalorder (!%p159_p3), %s720_s12, 1  ;;  %v730_v0 = vmov (!%p159_p3), 0   ;;  %vm350_vm0 = vcmask (!%p159_p3), 1041408   ;;  %v231_v2 = vld [vmem:[%s872_s2 + $0x10] sm:$0xff] (!%p159_p3)  ;;  %v229_v5 = vld [vmem:[%s872_s2] sm:$0xff] (!%p159_p3)  ;;  %v232_v8 = vld [vmem:[%s872_s2 + $0x18] sm:$0xff] (!%p159_p3) }
   0x7   : > { %162 = sbr.rel (%p159_p3) target bundleno = 262 (0x106), region = 32  ;;  %389 = vmatprep.mubr.bf16.mxu0 (!%p159_p3), %v730_v0  ;;  %419 = vmatprep.mubr.bf16.mxu1 (!%p159_p3), %v730_v0  ;;  %v230_v9 = vld [vmem:[%s872_s2 + $0x8] sm:$0xff] (!%p159_p3)  ;;  %v700_v10 = vld [vmem:[%s871_s1] sm:$0xff] (!%p159_p3)   ;;  %v701_v11 = vld [vmem:[%s871_s1 + $0x18] sm:$0xff] (!%p159_p3)   ;;  %vm331_vm1 = vcmask (!%p159_p3), 31744  }
   0x8   : > { %698 = vset.pattern.permute.xlu1 (!%p159_p3), %v730_v0  ;;  %697 = vset.pattern.permute.xlu0 (!%p159_p3), %v730_v0  ;;  %v234_v12 = vld [vmem:[%s872_s2 + $0x28] sm:$0xff] (!%p159_p3)  ;;  %v233_v13 = vld [vmem:[%s872_s2 + $0x20] sm:$0xff] (!%p159_p3)  ;;  %v236_v14 = vld [vmem:[%s872_s2 + $0x38] sm:$0xff] (!%p159_p3) }
   0x9   : > { %253 = vperm.xlu1 (!%p159_p3), %698, %v231_v2   ;;  %243 = vperm.xlu0 (!%p159_p3), %697, %v229_v5   ;;  %v235_v15 = vld [vmem:[%s872_s2 + $0x30] sm:$0xff] (!%p159_p3)  ;;  %v702_v16 = vld [vmem:[%s871_s1 + $0x8] sm:$0xff] (!%p159_p3)   ;;  %v703_v17 = vld [vmem:[%s871_s1 + $0x20] sm:$0xff] (!%p159_p3)  }
   0xa   : > { %v238_v18 = vld [vmem:[%s872_s2 + $0x48] sm:$0xff] (!%p159_p3)  ;;  %v237_v19 = vld [vmem:[%s872_s2 + $0x40] sm:$0xff] (!%p159_p3)  ;;  %v240_v20 = vld [vmem:[%s872_s2 + $0x58] sm:$0xff] (!%p159_p3) }
   0xb   : > { %v239_v21 = vld [vmem:[%s872_s2 + $0x50] sm:$0xff] (!%p159_p3)  ;;  %v705_v23 = vld [vmem:[%s871_s1 + $0x28] sm:$0xff] (!%p159_p3)  }
   0xc   : > { %v704_v22 = vld [vmem:[%s871_s1 + $0x10] sm:$0xff] (!%p159_p3)  }
   0xd   : > { %258 = vperm.xlu1 (!%p159_p3), %698, %v232_v8   ;;  %248 = vperm.xlu0 (!%p159_p3), %697, %v230_v9  }
   0xe   : > { %s879_s12 = smov (!%p191_p4, %s720_s12), 1 }
   0xf   : > { %s656_s16 = sshll.u32 %s879_s12, 3  ;;  %s671_s6 = smul.u32 96, %s879_s12 }
  0x10   : > { %s198_s19 = scalar_lea.vmem %s870_s0, %s656_s16 }
  0x11   : > { %v211_v1 = vld [vmem:[%s198_s19] sm:$0xff]  ;;  %268 = vperm.xlu1 %698, %v234_v12   ;;  %263 = vperm.xlu0 %697, %v233_v13   ;;  %s843_s9 = scalar_lea.vmem %s873_s3, %s671_s6 }
  0x12   : > { %v213_v3 = vcombine.high %v211_v1, %v211_v1  ;;  %v215_v4 = vpack.c.bf16 %v211_v1, %v211_v1 }
  0x14   : > { %v216_v6 = vpack.c.bf16 %v213_v3, %v213_v3  ;;  %v352_v7 = vsel %vm350_vm0, %v215_v4, 0 }
  0x15   : > { %278 = vperm.xlu1 %698, %v236_v14   ;;  %273 = vperm.xlu0 %697, %v235_v15  }
  0x16   : > { %635 = vmatprep.subr.msk.bf16.mxu0 %vm350_vm0, %v216_v6  ;;  %669 = vmatprep.subr.msk.bf16.mxu1 %vm350_vm0, %v216_v6 }
  0x17   : > { %358 = vmatpush1.bf16.msra.mxu0 %v352_v7  ;;  %670 = vmatpush1.bf16.msra.mxu1 %v352_v7 }
  0x19   : > { %288 = vperm.xlu1 %698, %v238_v18   ;;  %283 = vperm.xlu0 %697, %v237_v19  }
  0x1a   : > { %636 = vmatmul.mubr.msk.bf16.vlgmr.msra.gmra.mrb[0].mxu0 %vm331_vm1, %v700_v10  ;;  %639 = vmatmul.mubr.msk.bf16.vlgmr.msra.gmra.mrb[0].mxu1 %vm331_vm1, %v701_v11 }
  0x1b   : > { %399 = vmatprep.mubr.bf16.mxu0 %v730_v0  ;;  %429 = vmatprep.mubr.bf16.mxu1 %v730_v0 }
  0x1d   : > { %298 = vperm.xlu1 %698, %v240_v20   ;;  %293 = vperm.xlu0 %697, %v239_v21  }
  0x22   : > { %637 = vmatmul.mubr.msk.bf16.gmra.mrb[4].mxu0 %vm331_vm1, %v702_v16  ;;  %640 = vmatmul.mubr.msk.bf16.gmra.mrb[4].mxu1 %vm331_vm1, %v703_v17 }
  0x23   : > { %409 = vmatprep.mubr.bf16.mxu0 %v730_v0  ;;  %439 = vmatprep.mubr.bf16.mxu1 %v730_v0 }
  0x2a   : > { %638 = vmatmul.mubr.msk.bf16.gmra.mrb[8].mxu0 %vm331_vm1, %v704_v22  ;;  %641 = vmatmul.mubr.msk.bf16.gmra.mrb[8].mxu1 %vm331_vm1, %v705_v23 }
  0x88   : > { %v254_v24 = vpop.permute.xlu1 %253  ;;  %v244_v25 = vpop.permute.xlu0 %243 }
  0x8c   : > { %v259_v26 = vpop.permute.xlu1 %258  ;;  %v249_v27 = vpop.permute.xlu0 %248 }
  0x90   : > { %v835_v28 = vpop.permute.xlu1 %268  ;;  %v837_v29 = vpop.permute.xlu0 %263 }
  0x94   : > { %v279_v30 = vpop.permute.xlu1 %278  ;;  %v274_v31 = vpop.permute.xlu0 %273 }
  0x98   : > { %v289_v52 = vpop.permute.xlu1 %288  ;;  %v284_v53 = vpop.permute.xlu0 %283 }
  0x9c   : > { %v299_v10 = vpop.permute.xlu1 %298  ;;  %v294_v11 = vpop.permute.xlu0 %293 }
  0xed   : > { %v391_v32 = vpop.f32.mrb[0].mxu0  ;;  %v421_v33 = vpop.f32.mrb[0].mxu1 }
  0xee   : > { %v392_v34 = vadd.f32 %v391_v32, %v244_v25  ;;  %v422_v35 = vadd.f32 %v421_v33, %v274_v31  ;;  %v393_v36 = vpop.f32.mrb[1].mxu0  ;;  %v423_v37 = vpop.f32.mrb[1].mxu1 }
  0xef   : > { %v394_v38 = vadd.f32 %v393_v36, %v244_v25  ;;  %v424_v39 = vadd.f32 %v423_v37, %v274_v31  ;;  %v395_v40 = vpop.f32.mrb[2].mxu0  ;;  %v425_v41 = vpop.f32.mrb[2].mxu1 }
  0xf0   : > { %v396_v42 = vadd.f32 %v395_v40, %v249_v27  ;;  %v426_v43 = vadd.f32 %v425_v41, %v279_v30  ;;  %v397_v44 = vpop.f32.mrb[3].mxu0  ;;  %v427_v45 = vpop.f32.mrb[3].mxu1 }
  0xf1   : > { %v657_v46 = vpack.c.bf16 %v394_v38, %v392_v34  ;;  %v663_v47 = vpack.c.bf16 %v424_v39, %v422_v35  ;;  %v398_v48 = vadd.f32 %v397_v44, %v249_v27  ;;  %v428_v49 = vadd.f32 %v427_v45, %v279_v30 }
  0xf3   : > { %522 = vst [vmem:[%s843_s9] sm:$0xff] %v657_v46  ;;  %528 = vst [vmem:[%s843_s9 + $0x30] sm:$0xff] %v663_v47  ;;  %v658_v50 = vpack.c.bf16 %v398_v48, %v396_v42  ;;  %v664_v51 = vpack.c.bf16 %v428_v49, %v426_v43 }
  0xf5   : > { %523 = vst [vmem:[%s843_s9 + $0x8] sm:$0xff] %v658_v50  ;;  %529 = vst [vmem:[%s843_s9 + $0x38] sm:$0xff] %v664_v51  ;;  %v401_v54 = vpop.f32.mrb[4].mxu0  ;;  %v431_v55 = vpop.f32.mrb[4].mxu1 }
  0xf6   : > { %v402_v56 = vadd.f32 %v401_v54, %v254_v24  ;;  %v432_v57 = vadd.f32 %v431_v55, %v284_v53  ;;  %v403_v58 = vpop.f32.mrb[5].mxu0  ;;  %v433_v59 = vpop.f32.mrb[5].mxu1 }
  0xf7   : > { %v404_v60 = vadd.f32 %v403_v58, %v254_v24  ;;  %v434_v61 = vadd.f32 %v433_v59, %v284_v53  ;;  %v405_v62 = vpop.f32.mrb[6].mxu0  ;;  %v435_v63 = vpop.f32.mrb[6].mxu1 }
  0xf8   : > { %v406_v0 = vadd.f32 %v405_v62, %v259_v26  ;;  %v436_v1 = vadd.f32 %v435_v63, %v289_v52  ;;  %v407_v2 = vpop.f32.mrb[7].mxu0  ;;  %v437_v3 = vpop.f32.mrb[7].mxu1 }
  0xf9   : > { %v659_v4 = vpack.c.bf16 %v404_v60, %v402_v56  ;;  %v665_v5 = vpack.c.bf16 %v434_v61, %v432_v57  ;;  %v408_v6 = vadd.f32 %v407_v2, %v259_v26  ;;  %v438_v7 = vadd.f32 %v437_v3, %v289_v52 }
  0xfb   : > { %524 = vst [vmem:[%s843_s9 + $0x10] sm:$0xff] %v659_v4  ;;  %530 = vst [vmem:[%s843_s9 + $0x40] sm:$0xff] %v665_v5  ;;  %v660_v8 = vpack.c.bf16 %v408_v6, %v406_v0  ;;  %v666_v9 = vpack.c.bf16 %v438_v7, %v436_v1 }
  0xfd   : > { %525 = vst [vmem:[%s843_s9 + $0x18] sm:$0xff] %v660_v8  ;;  %531 = vst [vmem:[%s843_s9 + $0x48] sm:$0xff] %v666_v9  ;;  %v411_v12 = vpop.f32.mrb[8].mxu0  ;;  %v441_v13 = vpop.f32.mrb[8].mxu1 }
  0xfe   : > { %v412_v14 = vadd.f32 %v411_v12, %v837_v29  ;;  %v442_v15 = vadd.f32 %v441_v13, %v294_v11  ;;  %v413_v16 = vpop.f32.mrb[9].mxu0  ;;  %v443_v17 = vpop.f32.mrb[9].mxu1 }
  0xff   : > { %v414_v18 = vadd.f32 %v413_v16, %v837_v29  ;;  %v444_v19 = vadd.f32 %v443_v17, %v294_v11  ;;  %v415_v20 = vpop.f32.mrb[10].mxu0  ;;  %v445_v21 = vpop.f32.mrb[10].mxu1 }
 0x100   : > { %v416_v22 = vadd.f32 %v415_v20, %v835_v28  ;;  %v446_v23 = vadd.f32 %v445_v21, %v299_v10  ;;  %v417_v24 = vpop.f32.mrb[11].mxu0  ;;  %v447_v25 = vpop.f32.mrb[11].mxu1 }
 0x101   : > { %v661_v26 = vpack.c.bf16 %v414_v18, %v412_v14  ;;  %v667_v27 = vpack.c.bf16 %v444_v19, %v442_v15  ;;  %v418_v30 = vadd.f32 %v417_v24, %v835_v28  ;;  %v448_v31 = vadd.f32 %v447_v25, %v299_v10 }
 0x103   : > { %526 = vst [vmem:[%s843_s9 + $0x20] sm:$0xff] %v661_v26  ;;  %532 = vst [vmem:[%s843_s9 + $0x50] sm:$0xff] %v667_v27  ;;  %v662_v32 = vpack.c.bf16 %v418_v30, %v416_v22  ;;  %v668_v33 = vpack.c.bf16 %v448_v31, %v446_v23 }
 0x105   : > { %527 = vst [vmem:[%s843_s9 + $0x28] sm:$0xff] %v662_v32  ;;  %533 = vst [vmem:[%s843_s9 + $0x58] sm:$0xff] %v668_v33 }
 0x106 PF: > { %s13_s14 = sadd.s32 1, %s728_s14   ;;  %s874_s12 = smov %s724_s13 }
 0x107   : > { %p10_p5 = scmp.ge.s32.totalorder %s13_s14, 4   ;;  %s875_s13 = smov %s877_s15 }
 0x109   :  { %12 = sbr.rel (!%p10_p5) target bundleno = 2 (0x2), region = 62 }

// kernel: _lambda_.5
= control target key start
LH: loop header
LB: loop body
LE: loop exit
PB: predicated region body
PF: predicated region fallthrough
CT: control target
= control target key end

     0   :  { %s474_s12 = smov 0   ;;  %s476_s13 = smov 0   ;;  %s513_s0 = inlined_call_operand.vmem [shape: bf16[2,32,256], index: 0, kind: input, shape index: {}]   ;;  %s514_s1 = inlined_call_operand.vmem [shape: bf16[4,32], index: 1, kind: input, shape index: {}]   ;;  %s515_s2 = inlined_call_operand.vmem [shape: f32[4,1], index: 2, kind: input, shape index: {}]   ;;  %s516_s3 = inlined_call_operand.vmem [shape: f32[2,4,256], index: 3, kind: output, shape index: {}]  }
   0x1   :  { %s478_s14 = smov 0  }
   0x2 LB: > { %s25_s15 = sadd.s32 1, %s447_s13  ;;  %p383_p0 = scmp.ge.s32.totalorder %s451_s14, 1  ;;  %s451_s14 = sphi %s478_s14, %s13_s14   ;;  %s447_s13 = sphi %s476_s13, %s518_s13   ;;  %s443_s12 = sphi %s474_s12, %s517_s12  }
   0x3   : > { %p27_p1 = scmp.ge.s32.totalorder %s25_s15, 2  ;;  %p158_p2 = scmp.lt.s32.totalorder %s451_s14, 3 }
   0x5   : > { %s520_s15 = smov (%p27_p1, %s25_s15), 0  ;;  %p159_p3 = pnand %p383_p0, %p158_p2 }
   0x6   : > { %p191_p4 = scmp.lt.s32.totalorder (!%p159_p3), %s443_s12, 1  ;;  %v453_v0 = vmov (!%p159_p3), 0   ;;  %v216_v1 = vld [vmem:[%s515_s2] sm:$0xf] (!%p159_p3)  ;;  %vm242_vm0 = vcmask (!%p159_p3), 261120  }
   0x7   : > { %162 = sbr.rel (%p159_p3) target bundleno = 244 (0xf4), region = 32  ;;  %278 = vmatprep.mubr.bf16.mxu0 (!%p159_p3), %v453_v0  ;;  %422 = vset.pattern.permute.xlu0 (!%p159_p3), %v453_v0  ;;  %v215_v6 = vld [vmem:[%s514_s1] sm:$0x3] (!%p159_p3) }
   0x8   : > { %219 = vperm.xlu0 (!%p159_p3), %422, %v216_v1  }
   0xe   : > { %s522_s12 = smov (!%p191_p4, %s443_s12), 1 }
   0xf   : > { %s395_s18 = sshll.u32 %s522_s12, 5  ;;  %s396_s24 = sshll.u32 %s522_s12, 3 }
  0x10   : > { %s198_s21 = scalar_lea.vmem %s513_s0, %s395_s18  ;;  %s208_s27 = scalar_lea.vmem %s516_s3, %s396_s24 }
  0x11   : > { %v423_v2 = vld [vmem:[%s198_s21 + $0x4] ss:$8 sps:$4 sm:$0xff]   ;;  %v425_v3 = vld [vmem:[%s198_s21] ss:$8 sps:$4 sm:$0xff]   ;;  %v426_v4 = vld [vmem:[%s198_s21 + $0x14] ss:$8 sps:$4 sm:$0xff]  }
  0x12   : > { %246 = vmatprep.subr.bf16.mxu0 %v423_v2  ;;  %v428_v5 = vld [vmem:[%s198_s21 + $0x10] ss:$8 sps:$4 sm:$0xff]  }
  0x13   : > { %247 = vmatpush1.bf16.msra.mxu0 %v425_v3 }
  0x14   : > { %248 = vmatprep.subr.bf16.mxu0 %v426_v4 }
  0x17   : > { %249 = vmatpush1.bf16.msra.mxu0 %v428_v5 }
  0x1a   : > { %392 = vmatmul.mubr.msk.bf16.vlgmr.msra.gmra.mrb[0].mxu0 %vm242_vm0, %v215_v6 }
  0x87   : > { %v220_v7 = vpop.permute.xlu0 %219 }
  0xed   : > { %v280_v8 = vpop.f32.mrb[0].mxu0 }
  0xee   : > { %v281_v9 = vadd.f32 %v280_v8, %v220_v7  ;;  %v282_v10 = vpop.f32.mrb[1].mxu0 }
  0xef   : > { %v283_v11 = vadd.f32 %v282_v10, %v220_v7  ;;  %v284_v12 = vpop.f32.mrb[2].mxu0 }
  0xf0   : > { %v285_v13 = vpop.f32.mrb[3].mxu0 }
  0xf1   : > { %v289_v14 = vcombine.low %v281_v9, %v283_v11 }
  0xf3   : > { %291 = vst [vmem:[%s208_s27] sm:$0xff] %v289_v14 }
  0xf4 PF: > { %s13_s14 = sadd.s32 1, %s451_s14   ;;  %s517_s12 = smov %s447_s13 }
  0xf5   : > { %p10_p5 = scmp.ge.s32.totalorder %s13_s14, 4   ;;  %s518_s13 = smov %s520_s15 }
  0xf7   :  { %12 = sbr.rel (!%p10_p5) target bundleno = 2 (0x2), region = 62 }

// kernel: _lambda_.4
= control target key start
LH: loop header
LB: loop body
LE: loop exit
PB: predicated region body
PF: predicated region fallthrough
CT: control target
= control target key end

     0   :  { %s4226_s6 = smov 0   ;;  %s5088_s0 = inlined_call_operand.vmem [shape: bf16[2,256,96], index: 0, kind: input, shape index: {}]   ;;  %s5089_s1 = inlined_call_operand.vmem [shape: bf16[2,256,32], index: 1, kind: output, shape index: {}]  }
   0x1 LB: > { %s3564_s7 = sadd.s32 4294967295, %s4210_s6   ;;  %p3568_p0 = scmp.ge.s32.totalorder %s4210_s6, 1  ;;  %s4210_s6 = sphi %s4226_s6, %s11_s6  }
   0x2   : > { %p87_p1 = scmp.lt.s32.totalorder %s4210_s6, 3 }
   0x4   : > { %p88_p2 = pnand %p3568_p0, %p87_p1 }
   0x6   : > { %91 = sbr.rel (%p88_p2) target bundleno = 6370 (0x18e2), region = 24 }
   0xd   : > { %p107_p3 = scmp.lt.s32.totalorder %s3564_s7, 1  ;;  %vm182_vm0 = vcmask 261120   ;;  %vm295_vm1 = vcmask 523520   ;;  %s4212_s12 = smov 96   ;;  %vm440_vm2 = vcmask 1041409   ;;  %vm442_vm3 = vcmask 1042434  }
   0xe   : > { %vm444_vm4 = vcmask 1043459   ;;  %vm446_vm5 = vcmask 1044484   ;;  %vm448_vm6 = vcmask 1045509   ;;  %vm450_vm7 = vcmask 1046534   ;;  %s4215_s13 = smov 64  }
   0xf   : > { %s5166_s7 = smov (!%p107_p3, %s3564_s7), 1  ;;  %vm452_vm8 = vcmask 1047559   ;;  %vm4214_vm9 = vmmov 0   ;;  %vm1006_vm10 = vcmask 64512   ;;  %vm3183_vm12 = vcmask 1043456  }
  0x10   : > { %s3671_s8 = sshll.u32 %s5166_s7, 7  ;;  %vm3476_vm13 = vcmask 257024  }
  0x11   : > { %s4242_s11 = scalar_lea.vmem %s5088_s0, %s3671_s8  ;;  %s5019_s16 = scalar_lea.vmem %s5089_s1, %s3671_s8 }
  0x12   : > { %v4245_v0 = vld [vmem:[%s4242_s11] sm:$0xff]   ;;  %v4251_v2 = vld [vmem:[%s4242_s11 + $0x8] sm:$0xff]   ;;  %v4304_v25 = vld [vmem:[%s4242_s11 + $0x50] sm:$0xff]  }
  0x13   : > { %v4248_v1 = vld [vmem:[%s4242_s11 + $0x40] sm:$0xff]   ;;  %v4254_v3 = vunpack.c.h.bf16 %v4245_v0  ;;  %v4257_v4 = vunpack.c.l.bf16 %v4245_v0  ;;  %v4266_v7 = vunpack.c.h.bf16 %v4251_v2  ;;  %670 = vrot.lane.b32.xlu0 %v4245_v0, %s4212_s12  ;;  %672 = vrot.lane.b32.xlu1 %v4251_v2, %s4212_s12  ;;  %v4285_v16 = vld [vmem:[%s4242_s11 + $0x48] sm:$0xff]   ;;  %v4298_v23 = vunpack.c.l.bf16 %v4251_v2 }
  0x14   : > { %v4260_v5 = vunpack.c.l.bf16 %v4248_v1  ;;  %v4263_v6 = vunpack.c.h.bf16 %v4248_v1  ;;  %4005 = vmatprep.subr.msk.bf16.mxu0 %vm182_vm0, %v4248_v1  ;;  %v4301_v24 = vunpack.c.l.bf16 %v4285_v16  ;;  %v4309_v26 = vunpack.c.h.bf16 %v4285_v16  ;;  %v4334_v43 = vld [vmem:[%s4242_s11 + $0x10] sm:$0xff]   ;;  %v4351_v57 = vld [vmem:[%s4242_s11 + $0x58] sm:$0xff]  }
  0x15   : > { %v184_v8 = vsel %vm182_vm0, %v4254_v3, 0.0  ;;  %v297_v9 = vsel %vm295_vm1, %v4254_v3, 0.0  ;;  %v183_v10 = vsel %vm182_vm0, %v4257_v4, 0.0  ;;  %v296_v11 = vsel %vm295_vm1, %v4257_v4, 0.0 }
  0x16   : > { %5114 = vst [vmem:[#allocation2_spill] sm:$0xff] %v4260_v5  ;;  %5115 = vst [vmem:[#allocation3_spill] sm:$0xff] %v4263_v6  ;;  %v185_v12 = vadd.f32 %v184_v8, %v183_v10  ;;  %v298_v13 = vadd.f32 %v297_v9, %v296_v11  ;;  %v235_v14 = vsel %vm182_vm0, %v4260_v5, 0.0  ;;  %v236_v15 = vsel %vm182_vm0, %v4263_v6, 0.0 }
  0x17   : > { %v237_v17 = vadd.f32 %v236_v15, %v235_v14  ;;  %v348_v18 = vsel %vm295_vm1, %v4260_v5, 0.0  ;;  %v349_v19 = vsel %vm295_vm1, %v4263_v6, 0.0  ;;  %v188_v20 = vsel %vm182_vm0, %v4266_v7, 0.0  ;;  %5116 = vst [vmem:[#allocation4_spill] sm:$0xff] %v4301_v24  ;;  %686 = vrot.lane.b32.xlu0 %v4248_v1, %s4212_s12  ;;  %5117 = vst [vmem:[#allocation5_spill] sm:$0xff] %v4309_v26  ;;  %688 = vrot.lane.b32.xlu1 %v4285_v16, %s4212_s12 }
  0x18   : > { %v350_v21 = vadd.f32 %v349_v19, %v348_v18  ;;  %v301_v22 = vsel %vm295_vm1, %v4266_v7, 0.0  ;;  %v4312_v27 = vunpack.c.l.bf16 %v4304_v25  ;;  %v4315_v28 = vunpack.c.h.bf16 %v4304_v25 }
  0x19   : > { %v186_v29 = vsel %vm182_vm0, %v4298_v23, 0.0  ;;  %v299_v30 = vsel %vm295_vm1, %v4298_v23, 0.0  ;;  %v238_v31 = vsel %vm182_vm0, %v4301_v24, 0.0  ;;  %v351_v32 = vsel %vm295_vm1, %v4301_v24, 0.0 }
  0x1a   : > { %5118 = vst [vmem:[#allocation6_spill] sm:$0xff] %v4312_v27  ;;  %5119 = vst [vmem:[#allocation7_spill] sm:$0xff] %v4315_v28  ;;  %v187_v33 = vadd.f32 %v186_v29, %v185_v12  ;;  %v300_v34 = vadd.f32 %v299_v30, %v298_v13  ;;  %v239_v35 = vadd.f32 %v238_v31, %v237_v17  ;;  %v240_v36 = vsel %vm182_vm0, %v4309_v26, 0.0 }
  0x1b   : > { %v352_v37 = vadd.f32 %v351_v32, %v350_v21  ;;  %v353_v38 = vsel %vm295_vm1, %v4309_v26, 0.0  ;;  %v248_v42 = vsel %vm182_vm0, %v4312_v27, 0.0  ;;  %v249_v45 = vsel %vm182_vm0, %v4315_v28, 0.0  ;;  %690 = vrot.lane.b32.xlu1 %v4304_v25, %s4212_s12  ;;  %674 = vrot.lane.b32.xlu0 %v4334_v43, %s4212_s12 }
  0x1c   : > { %v189_v39 = vadd.f32 %v188_v20, %v187_v33  ;;  %v302_v40 = vadd.f32 %v301_v22, %v300_v34  ;;  %v241_v41 = vadd.f32 %v240_v36, %v239_v35  ;;  %v361_v46 = vsel %vm295_vm1, %v4312_v27, 0.0  ;;  %v4376_v33 = vld [vmem:[%s4242_s11 + $0x18] sm:$0xff]  }
  0x1d   : > { %v354_v44 = vadd.f32 %v353_v38, %v352_v37  ;;  %v362_v50 = vsel %vm295_vm1, %v4315_v28, 0.0  ;;  %v4345_v52 = vunpack.c.l.bf16 %v4334_v43  ;;  %v4348_v56 = vunpack.c.h.bf16 %v4334_v43  ;;  %v4557_v28 = vld [vmem:[%s4242_s11 + $0x38] sm:$0xff]  }
  0x1e   : > { %v190_v47 = vrot.slane %v189_v39, 4  ;;  %v303_v48 = vrot.slane %v302_v40, 4  ;;  %v242_v49 = vrot.slane %v241_v41, 4  ;;  %v250_v59 = vadd.f32 %v249_v45, %v248_v42 }
  0x1f   : > { %v355_v51 = vrot.slane %v354_v44, 4  ;;  %v363_v60 = vadd.f32 %v362_v50, %v361_v46  ;;  %v4356_v61 = vunpack.c.l.bf16 %v4351_v57  ;;  %v196_v8 = vsel %vm182_vm0, %v4345_v52, 0.0  ;;  %692 = vrot.lane.b32.xlu1 %v4351_v57, %s4212_s12  ;;  %676 = vrot.lane.b32.xlu0 %v4376_v33, %s4212_s12 }
  0x20   : > { %v191_v53 = vadd.f32 %v190_v47, %v189_v39  ;;  %v304_v54 = vadd.f32 %v303_v48, %v302_v40  ;;  %v243_v55 = vadd.f32 %v242_v49, %v241_v41  ;;  %v197_v9 = vsel %vm182_vm0, %v4348_v56, 0.0 }
  0x21   : > { %v356_v58 = vadd.f32 %v355_v51, %v354_v44  ;;  %5120 = vst [vmem:[#allocation8_spill] sm:$0xff] %v4356_v61  ;;  %v309_v11 = vsel %vm295_vm1, %v4345_v52, 0.0  ;;  %v4365_v12 = vunpack.c.h.bf16 %v4351_v57  ;;  %v251_v13 = vsel %vm182_vm0, %v4356_v61, 0.0 }
  0x22   : > { %v192_v62 = vrot.slane %v191_v53, 2  ;;  %v305_v63 = vrot.slane %v304_v54, 2  ;;  %v244_v17 = vrot.slane %v243_v55, 2  ;;  %v310_v18 = vsel %vm295_vm1, %v4348_v56, 0.0 }
  0x23   : > { %v357_v10 = vrot.slane %v356_v58, 2  ;;  %5121 = vst [vmem:[#allocation9_spill] sm:$0xff] %v4365_v12  ;;  %v198_v19 = vadd.f32 %v197_v9, %v196_v8  ;;  %v252_v20 = vadd.f32 %v251_v13, %v250_v59  ;;  %v253_v21 = vsel %vm182_vm0, %v4365_v12, 0.0 }
  0x24   : > { %v193_v14 = vadd.f32 %v192_v62, %v191_v53  ;;  %v306_v15 = vadd.f32 %v305_v63, %v304_v54  ;;  %v364_v22 = vsel %vm295_vm1, %v4356_v61, 0.0  ;;  %v311_v34 = vadd.f32 %v310_v18, %v309_v11 }
  0x25   : > { %v358_v31 = vadd.f32 %v357_v10, %v356_v58  ;;  %v365_v32 = vadd.f32 %v364_v22, %v363_v60  ;;  %v254_v35 = vadd.f32 %v253_v21, %v252_v20  ;;  %v366_v36 = vsel %vm295_vm1, %v4365_v12, 0.0  ;;  %v4403_v58 = vld [vmem:[%s4242_s11 + $0x60] sm:$0xff]  }
  0x26   : > { %v194_v29 = vrot.slane %v193_v14, 1  ;;  %v307_v30 = vrot.slane %v306_v15, 1  ;;  %v4381_v40 = vunpack.c.l.bf16 %v4376_v33  ;;  %v4383_v41 = vadd.f32 %v244_v17, %v243_v55  ;;  %v4427_v21 = vld [vmem:[%s4242_s11 + $0x20] sm:$0xff]   ;;  %694 = vrot.lane.b32.xlu1 %v4403_v58, %s4212_s12 }
  0x27   : > { %v367_v39 = vadd.f32 %v366_v36, %v365_v32  ;;  %v4388_v42 = vunpack.c.h.bf16 %v4376_v33  ;;  %v359_v44 = vrot.slane %v358_v31, 1  ;;  %v255_v45 = vrot.slane %v254_v35, 4  ;;  %v4440_v36 = vld [vmem:[%s4242_s11 + $0x68] sm:$0xff]   ;;  %678 = vrot.lane.b32.xlu0 %v4427_v21, %s4212_s12 }
  0x28   : > { %v195_v37 = vadd.f32 %v194_v29, %v193_v14  ;;  %v308_v38 = vadd.f32 %v307_v30, %v306_v15  ;;  %v199_v47 = vsel %vm182_vm0, %v4381_v40, 0.0  ;;  %v312_v51 = vsel %vm295_vm1, %v4381_v40, 0.0 }
  0x29   : > { %v368_v46 = vrot.slane %v367_v39, 4  ;;  %v200_v49 = vadd.f32 %v199_v47, %v198_v19  ;;  %v201_v50 = vsel %vm182_vm0, %v4388_v42, 0.0  ;;  %v313_v55 = vadd.f32 %v312_v51, %v311_v34 }
  0x2a   : > { %v4392_v48 = vmul.f32 0.001953125, %v195_v37  ;;  %v4400_v53 = vmul.f32 0.001953125, %v308_v38  ;;  %v314_v60 = vsel %vm295_vm1, %v4388_v42, 0.0  ;;  %v4408_v62 = vunpack.c.l.bf16 %v4403_v58  ;;  %696 = vrot.lane.b32.xlu1 %v4440_v36, %s4212_s12 }
  0x2b   : > { %v369_v54 = vadd.f32 %v368_v46, %v367_v39  ;;  %v202_v59 = vadd.f32 %v201_v50, %v200_v49  ;;  %v4411_v8 = vadd.f32 %v359_v44, %v358_v31  ;;  %v315_v9 = vadd.f32 %v314_v60, %v313_v55 }
  0x2c   : > { %5122 = vst [vmem:[#allocation10_spill] sm:$0xff] %v4408_v62  ;;  %v4414_v10 = vunpack.c.h.bf16 %v4403_v58  ;;  %v4418_v13 = vadd.f32 %v255_v45, %v254_v35  ;;  %v261_v15 = vsel %vm182_vm0, %v4408_v62, 0.0  ;;  %v416_v17 = vpack.c.bf16 %v4400_v53, %v4400_v53 }
  0x2d   : > { %v203_v14 = vrot.slane %v202_v59, 4  ;;  %v370_v18 = vrot.slane %v369_v54, 2  ;;  %v316_v19 = vrot.slane %v315_v9, 4  ;;  %v374_v29 = vsel %vm295_vm1, %v4408_v62, 0.0 }
  0x2e   : > { %5123 = vst [vmem:[#allocation11_spill] sm:$0xff] %v4414_v10  ;;  %v262_v20 = vsel %vm182_vm0, %v4414_v10, 0.0  ;;  %v375_v30 = vsel %vm295_vm1, %v4414_v10, 0.0  ;;  %v4434_v34 = vunpack.c.l.bf16 %v4427_v21  ;;  %v4437_v35 = vunpack.c.h.bf16 %v4427_v21 }
  0x2f   : > { %v204_v22 = vadd.f32 %v203_v14, %v202_v59  ;;  %v317_v31 = vadd.f32 %v316_v19, %v315_v9  ;;  %v263_v32 = vadd.f32 %v262_v20, %v261_v15  ;;  %v4445_v38 = vunpack.c.l.bf16 %v4440_v36  ;;  %v4463_v59 = vld [vmem:[%s4242_s11 + $0x28] sm:$0xff]  }
  0x30   : > { %5124 = vst [vmem:[#allocation12_spill] sm:$0xff] %v4434_v34  ;;  %5125 = vst [vmem:[#allocation13_spill] sm:$0xff] %v4437_v35  ;;  %v4448_v39 = vunpack.c.h.bf16 %v4440_v36  ;;  %v376_v45 = vadd.f32 %v375_v30, %v374_v29  ;;  %v209_v46 = vsel %vm182_vm0, %v4434_v34, 0.0  ;;  %v210_v47 = vsel %vm182_vm0, %v4437_v35, 0.0  ;;  %680 = vrot.lane.b32.xlu0 %v4463_v59, %s4212_s12 }
  0x31   : > { %v205_v37 = vrot.slane %v204_v22, 2  ;;  %5126 = vst [vmem:[#allocation14_spill] sm:$0xff] %v4445_v38  ;;  %v318_v44 = vrot.slane %v317_v31, 2  ;;  %v322_v50 = vsel %vm295_vm1, %v4434_v34, 0.0  ;;  %v323_v51 = vsel %vm295_vm1, %v4437_v35, 0.0 }
  0x32   : > { %5127 = vst [vmem:[#allocation15_spill] sm:$0xff] %v4448_v39  ;;  %v264_v55 = vsel %vm182_vm0, %v4445_v38, 0.0  ;;  %v211_v9 = vadd.f32 %v210_v47, %v209_v46  ;;  %v266_v15 = vsel %vm182_vm0, %v4448_v39, 0.0  ;;  %v377_v20 = vsel %vm295_vm1, %v4445_v38, 0.0  ;;  %v4483_v46 = vld [vmem:[%s4242_s11 + $0x70] sm:$0xff]  }
  0x33   : > { %v206_v49 = vadd.f32 %v205_v37, %v204_v22  ;;  %v319_v60 = vadd.f32 %v318_v44, %v317_v31  ;;  %v265_v14 = vadd.f32 %v264_v55, %v263_v32  ;;  %v379_v22 = vsel %vm295_vm1, %v4448_v39, 0.0  ;;  %698 = vrot.lane.b32.xlu1 %v4483_v46, %s4212_s12 }
  0x34   : > { %v324_v30 = vadd.f32 %v323_v51, %v322_v50  ;;  %v378_v37 = vadd.f32 %v377_v20, %v376_v45  ;;  %v4472_v11 = vunpack.c.l.bf16 %v4463_v59  ;;  %v257_v31 = vrot.slane %v4418_v13, 2 }
  0x35   : > { %v207_v19 = vrot.slane %v206_v49, 1  ;;  %v320_v29 = vrot.slane %v319_v60, 1  ;;  %v4475_v44 = vadd.f32 %v370_v18, %v369_v54  ;;  %v4480_v32 = vunpack.c.h.bf16 %v4463_v59 }
  0x36   : > { %5128 = vst [vmem:[#allocation16_spill] sm:$0xff] %v4472_v11  ;;  %v4485_v55 = vadd.f32 %v266_v15, %v265_v14  ;;  %v380_v50 = vadd.f32 %v379_v22, %v378_v37  ;;  %v212_v45 = vsel %vm182_vm0, %v4472_v11, 0.0  ;;  %v325_v18 = vsel %vm295_vm1, %v4472_v11, 0.0 }
  0x37   : > { %5129 = vst [vmem:[#allocation17_spill] sm:$0xff] %v4480_v32  ;;  %v321_v47 = vadd.f32 %v320_v29, %v319_v60  ;;  %v208_v51 = vadd.f32 %v207_v19, %v206_v49  ;;  %v213_v20 = vadd.f32 %v212_v45, %v211_v9  ;;  %v214_v54 = vsel %vm182_vm0, %v4480_v32, 0.0  ;;  %v4512_v45 = vld [vmem:[%s4242_s11 + $0x30] sm:$0xff]  }
  0x38   : > { %v381_v60 = vrot.slane %v380_v50, 4  ;;  %v326_v14 = vadd.f32 %v325_v18, %v324_v30  ;;  %v4498_v15 = vunpack.c.l.bf16 %v4483_v46  ;;  %v4500_v22 = vunpack.c.l.b16 %v416_v17  ;;  %682 = vrot.lane.b32.xlu0 %v4512_v45, %s4212_s12 }
  0x39   : > { %v4495_v63 = vmul.f32 0.001953125, %v321_v47  ;;  %v215_v49 = vadd.f32 %v214_v54, %v213_v20  ;;  %v327_v9 = vsel %vm295_vm1, %v4480_v32, 0.0  ;;  %v4505_v19 = vunpack.c.h.bf16 %v4483_v46 }
  0x3a   : > { %5130 = vst [vmem:[#allocation18_spill] sm:$0xff] %v4498_v15  ;;  %v4508_v29 = vadd.f32 %v257_v31, %v4418_v13  ;;  %v372_v37 = vrot.slane %v4475_v44, 1  ;;  %v382_v47 = vadd.f32 %v381_v60, %v380_v50  ;;  %v328_v30 = vadd.f32 %v327_v9, %v326_v14  ;;  %v4526_v50 = vld [vmem:[%s4242_s11 + $0x78] sm:$0xff]  }
  0x3b   : > { %5131 = vst [vmem:[#allocation19_spill] sm:$0xff] %v4505_v19  ;;  %v4514_v18 = vmul.f32 0.001953125, %v208_v51  ;;  %v417_v17 = vpack.c.bf16 %v4495_v63, %v4495_v63  ;;  %v216_v54 = vrot.slane %v215_v49, 4  ;;  %v274_v38 = vsel %vm182_vm0, %v4498_v15, 0.0  ;;  %700 = vrot.lane.b32.xlu1 %v4526_v50, %s4212_s12 }
  0x3c   : > { %v329_v39 = vrot.slane %v328_v30, 4  ;;  %v387_v13 = vsel %vm295_vm1, %v4498_v15, 0.0  ;;  %v388_v31 = vsel %vm295_vm1, %v4505_v19, 0.0  ;;  %v383_v51 = vrot.slane %v382_v47, 2  ;;  %684 = vrot.lane.b32.xlu0 %v4557_v28, %s4212_s12 }
  0x3d   : > { %v217_v60 = vadd.f32 %v216_v54, %v215_v49  ;;  %v4529_v14 = vunpack.c.l.bf16 %v4512_v45  ;;  %v275_v20 = vsel %vm182_vm0, %v4505_v19, 0.0  ;;  %v4534_v10 = vunpack.c.h.bf16 %v4512_v45 }
  0x3e   : > { %v330_v9 = vadd.f32 %v329_v39, %v328_v30  ;;  %v4536_v62 = vunpack.c.l.b16 %v417_v17  ;;  %v389_v12 = vadd.f32 %v388_v31, %v387_v13  ;;  %v4541_v49 = vunpack.c.l.bf16 %v4526_v50 }
  0x3f   : > { %5132 = vst [vmem:[#allocation20_spill] sm:$0xff] %v4529_v14  ;;  %5133 = vst [vmem:[#allocation21_spill] sm:$0xff] %v4534_v10  ;;  %v218_v15 = vrot.slane %v217_v60, 2  ;;  %v222_v39 = vsel %vm182_vm0, %v4529_v14, 0.0  ;;  %v223_v30 = vsel %vm182_vm0, %v4534_v10, 0.0  ;;  %v4550_v17 = vunpack.c.h.bf16 %v4526_v50 }
  0x40   : > { %5134 = vst [vmem:[#allocation22_spill] sm:$0xff] %v4541_v49  ;;  %v331_v54 = vrot.slane %v330_v9, 2  ;;  %v384_v13 = vadd.f32 %v383_v51, %v382_v47  ;;  %v276_v31 = vadd.f32 %v275_v20, %v274_v38  ;;  %v335_v19 = vsel %vm295_vm1, %v4529_v14, 0.0 }
  0x41   : > { %5135 = vst [vmem:[#allocation23_spill] sm:$0xff] %v4550_v17  ;;  %v336_v61 = vsel %vm295_vm1, %v4534_v10, 0.0  ;;  %v219_v27 = vadd.f32 %v218_v15, %v217_v60  ;;  %v277_v24 = vsel %vm182_vm0, %v4541_v49, 0.0  ;;  %v390_v6 = vsel %vm295_vm1, %v4541_v49, 0.0 }
  0x42   : > { %v332_v26 = vadd.f32 %v331_v54, %v330_v9  ;;  %v224_v5 = vadd.f32 %v223_v30, %v222_v39  ;;  %v391_v32 = vadd.f32 %v390_v6, %v389_v12  ;;  %v392_v38 = vsel %vm295_vm1, %v4550_v17, 0.0 }
  0x43   : > { %v337_v20 = vadd.f32 %v336_v61, %v335_v19  ;;  %v4566_v51 = vunpack.c.l.bf16 %v4557_v28  ;;  %v4569_v15 = vunpack.c.h.bf16 %v4557_v28  ;;  %v278_v60 = vadd.f32 %v277_v24, %v276_v31 }
  0x44   : > { %v333_v47 = vrot.slane %v332_v26, 1  ;;  %v393_v9 = vadd.f32 %v392_v38, %v391_v32  ;;  %v373_v54 = vadd.f32 %v372_v37, %v4475_v44  ;;  %v279_v12 = vsel %vm182_vm0, %v4550_v17, 0.0 }
  0x45   : > { %5136 = vst [vmem:[#allocation24_spill] sm:$0xff] %v4566_v51  ;;  %5137 = vst [vmem:[#allocation25_spill] sm:$0xff] %v4569_v15  ;;  %v225_v61 = vsel %vm182_vm0, %v4566_v51, 0.0  ;;  %v227_v19 = vsel %vm182_vm0, %v4569_v15, 0.0  ;;  %v220_v39 = vrot.slane %v219_v27, 1  ;;  %v338_v32 = vsel %vm295_vm1, %v4566_v51, 0.0 }
  0x46   : > { %v334_v6 = vadd.f32 %v333_v47, %v332_v26  ;;  %v394_v30 = vrot.slane %v393_v9, 4  ;;  %v226_v24 = vadd.f32 %v225_v61, %v224_v5  ;;  %v339_v44 = vadd.f32 %v338_v32, %v337_v20 }
  0x47   : > { %v340_v37 = vsel %vm295_vm1, %v4569_v15, 0.0  ;;  %v385_v31 = vrot.slane %v384_v13, 1  ;;  %v4587_v17 = vmul.f32 0.001953125, %v4411_v8  ;;  %v4589_v49 = vmul.f32 0.001953125, %v373_v54 }
  0x48   : > { %v402_v26 = vmul.f32 0.001953125, %v334_v6  ;;  %v395_v38 = vadd.f32 %v394_v30, %v393_v9  ;;  %v228_v47 = vadd.f32 %v227_v19, %v226_v24  ;;  %v280_v61 = vadd.f32 %v279_v12, %v278_v60 }
  0x49   : > { %v341_v10 = vadd.f32 %v340_v37, %v339_v44  ;;  %v386_v51 = vadd.f32 %v385_v31, %v384_v13  ;;  %v5138_v14 = vrot.slane %v4485_v55, 4  ;;  %v221_v20 = vadd.f32 %v220_v39, %v219_v27 }
  0x4a   : > { %v418_v5 = vpack.c.bf16 %v402_v26, %v402_v26  ;;  %v396_v32 = vrot.slane %v395_v38, 2  ;;  %v229_v11 = vrot.slane %v228_v47, 4  ;;  %v420_v8 = vpack.c.bf16 %v4587_v17, %v4587_v17 }
  0x4b   : > { %v269_v6 = vadd.f32 %v5138_v14, %v4485_v55  ;;  %v342_v15 = vrot.slane %v341_v10, 4  ;;  %v4594_v35 = vmul.f32 0.001953125, %v386_v51  ;;  %v421_v9 = vpack.c.bf16 %v4589_v49, %v4589_v49 }
  0x4c   : > { %v409_v60 = vpack.c.bf16 %v4514_v18, %v4514_v18  ;;  %v230_v13 = vadd.f32 %v229_v11, %v228_v47  ;;  %v397_v54 = vadd.f32 %v396_v32, %v395_v38  ;;  %v434_v12 = vunpack.c.l.b16 %v418_v5 }
  0x4d   : > { %v281_v19 = vrot.slane %v280_v61, 4  ;;  %v343_v55 = vadd.f32 %v342_v15, %v341_v10  ;;  %v441_v27 = vsel %vm440_vm2, %v4536_v62, %v4500_v22  ;;  %v853_v14 = vsel %vm440_vm2, %v4495_v63, %v4400_v53 }
  0x4e   : > { %v4608_v51 = vmul.f32 0.001953125, %v221_v20  ;;  %v231_v39 = vrot.slane %v230_v13, 2  ;;  %v398_v30 = vrot.slane %v397_v54, 1  ;;  %v541_v24 = vsel %vm182_vm0, %v4245_v0, 0 }
  0x4f   : > { %v344_v11 = vrot.slane %v343_v55, 2  ;;  %v422_v44 = vpack.c.bf16 %v4594_v35, %v4594_v35  ;;  %v4614_v10 = vunpack.c.l.b16 %v420_v8  ;;  %v4616_v15 = vunpack.c.l.b16 %v421_v9  ;;  %3706 = vmatpush3.bf16.xpose.msra.mxu0 %v541_v24 }
  0x50   : > { %v232_v62 = vadd.f32 %v231_v39, %v230_v13  ;;  %v399_v22 = vadd.f32 %v398_v30, %v397_v54  ;;  %v443_v53 = vsel %vm442_vm3, %v434_v12, %v441_v27  ;;  %v854_v63 = vsel %vm442_vm3, %v402_v26, %v853_v14  ;;  %4006 = vmatprep.subr.msk.bf16.mxu0 %vm182_vm0, %v4285_v16 }
  0x51   : > { %v345_v37 = vadd.f32 %v344_v11, %v343_v55  ;;  %v544_v31 = vsel %vm182_vm0, %v4251_v2, 0  ;;  %v5139_v38 = vrot.slane %v4383_v41, 1  ;;  %v259_v5 = vrot.slane %v4508_v29, 1 }
  0x52   : > { %v233_v20 = vrot.slane %v232_v62, 1  ;;  %v407_v32 = vmul.f32 0.001953125, %v399_v22  ;;  %v270_v8 = vrot.slane %v269_v6, 2  ;;  %v282_v9 = vadd.f32 %v281_v19, %v280_v61 }
  0x53   : > { %v247_v47 = vadd.f32 %v5139_v38, %v4383_v41  ;;  %v346_v26 = vrot.slane %v345_v37, 1  ;;  %v260_v13 = vadd.f32 %v259_v5, %v4508_v29  ;;  %v410_v12 = vpack.c.bf16 %v4608_v51, %v4608_v51 }
  0x54   : > { %v234_v55 = vadd.f32 %v233_v20, %v232_v62  ;;  %v438_v27 = vunpack.c.l.b16 %v422_v44  ;;  %v271_v41 = vadd.f32 %v270_v8, %v269_v6  ;;  %v283_v14 = vrot.slane %v282_v9, 2 }
  0x55   : > { %v4629_v54 = vmul.f32 0.001953125, %v247_v47  ;;  %v347_v39 = vadd.f32 %v346_v26, %v345_v37  ;;  %v292_v30 = vmul.f32 0.001953125, %v260_v13  ;;  %v5140_v61 = vpack.c.bf16 %v4392_v48, %v4392_v48 }
  0x56   : > { %v423_v29 = vpack.c.bf16 %v407_v32, %v407_v32  ;;  %v272_v11 = vrot.slane %v271_v41, 1  ;;  %v284_v22 = vadd.f32 %v283_v14, %v282_v9  ;;  %v290_v38 = vmul.f32 0.001953125, %v234_v55 }
  0x57   : > { %v412_v24 = vpack.c.bf16 %v4629_v54, %v4629_v54  ;;  %v654_v19 = vunpack.c.l.b16 %v5140_v61  ;;  %v403_v47 = vmul.f32 0.001953125, %v347_v39  ;;  %3708 = vmatpush3.bf16.xpose.msra.mxu0 %v544_v31  ;;  %v413_v62 = vpack.c.bf16 %v292_v30, %v292_v30 }
  0x58   : > { %v655_v44 = vunpack.c.l.b16 %v409_v60  ;;  %v656_v5 = vunpack.c.l.b16 %v410_v12  ;;  %4007 = vmatprep.subr.msk.bf16.mxu0 %vm182_vm0, %v4304_v25  ;;  %v273_v6 = vadd.f32 %v272_v11, %v271_v41  ;;  %v285_v37 = vrot.slane %v284_v22, 1 }
  0x59   : > { %v411_v20 = vpack.c.bf16 %v290_v38, %v290_v38  ;;  %v658_v8 = vunpack.c.l.b16 %v412_v24  ;;  %v419_v26 = vpack.c.bf16 %v403_v47, %v403_v47  ;;  %v855_v13 = vsel %vm444_vm4, %v403_v47, %v854_v63 }
  0x5a   : > { %v659_v61 = vunpack.c.l.b16 %v413_v62  ;;  %v662_v34 = vsel %vm440_vm2, %v655_v44, %v654_v19  ;;  %v856_v9 = vsel %vm446_vm5, %v4587_v17, %v855_v13  ;;  %v286_v31 = vadd.f32 %v285_v37, %v284_v22 }
  0x5b   : > { %v293_v55 = vmul.f32 0.001953125, %v273_v6  ;;  %v657_v60 = vunpack.c.l.b16 %v411_v20  ;;  %v435_v12 = vunpack.c.l.b16 %v419_v26  ;;  %v857_v14 = vsel %vm448_vm6, %v4589_v49, %v856_v9 }
  0x5c   : > { %v547_v41 = vsel %vm182_vm0, %v4334_v43, 0  ;;  %v663_v39 = vsel %vm442_vm3, %v656_v5, %v662_v34  ;;  %v858_v63 = vsel %vm450_vm7, %v4594_v35, %v857_v14  ;;  %v294_v24 = vmul.f32 0.001953125, %v286_v31 }
  0x5d   : > { %v414_v19 = vpack.c.bf16 %v293_v55, %v293_v55  ;;  %v664_v11 = vsel %vm444_vm4, %v657_v60, %v663_v39  ;;  %v439_v17 = vunpack.c.l.b16 %v423_v29  ;;  %v445_v22 = vsel %vm444_vm4, %v435_v12, %v443_v53 }
  0x5e   : > { %v859_v47 = vsel %vm452_vm8, %v407_v32, %v858_v63  ;;  %v665_v62 = vsel %vm446_vm5, %v658_v8, %v664_v11  ;;  %v447_v49 = vsel %vm446_vm5, %v4614_v10, %v445_v22  ;;  %v415_v34 = vpack.c.bf16 %v294_v24, %v294_v24 }
  0x5f   : > { %860 = vrot.lane.b32.xlu0 %v859_v47, %s4212_s12  ;;  %v660_v44 = vunpack.c.l.b16 %v414_v19  ;;  %v666_v35 = vsel %vm448_vm6, %v659_v61, %v665_v62  ;;  %v449_v5 = vsel %vm448_vm6, %v4616_v15, %v447_v49  ;;  %3710 = vmatpush3.bf16.xpose.msra.mxu0 %v547_v41  ;;  %v838_v53 = vsel %vm440_vm2, %v4514_v18, %v4392_v48 }
  0x60   : > { %v451_v32 = vsel %vm450_vm7, %v438_v27, %v449_v5  ;;  %4008 = vmatprep.subr.msk.bf16.mxu0 %vm182_vm0, %v4351_v57  ;;  %v661_v10 = vunpack.c.l.b16 %v415_v34  ;;  %v839_v6 = vsel %vm442_vm3, %v4608_v51, %v838_v53  ;;  %v550_v26 = vsel %vm182_vm0, %v4376_v33, 0 }
  0x61   : > { %v667_v29 = vsel %vm450_vm7, %v660_v44, %v666_v35  ;;  %v453_v37 = vsel %vm452_vm8, %v439_v17, %v451_v32  ;;  %v840_v15 = vsel %vm444_vm4, %v290_v38, %v839_v6  ;;  %v559_v13 = vsel %vm182_vm0, %v4512_v45, 0 }
  0x62   : > { %v454_v20 = vpack.c.b16 %v453_v37, %v453_v37  ;;  %v668_v8 = vsel %vm452_vm8, %v661_v10, %v667_v29  ;;  %v841_v48 = vsel %vm446_vm5, %v4629_v54, %v840_v15  ;;  %v553_v54 = vsel %vm182_vm0, %v4427_v21, 0 }
  0x63   : > { %v4675_v18 = vpack.c.b16 %v668_v8, %v668_v8  ;;  %v842_v27 = vsel %vm448_vm6, %v292_v30, %v841_v48  ;;  %v556_v30 = vsel %vm182_vm0, %v4463_v59, 0  ;;  %v562_v31 = vsel %vm182_vm0, %v4557_v28, 0 }
  0x64   : > { %455 = vrot.lane.b32.xlu1 %v454_v20, %s4212_s12  ;;  %v843_v51 = vsel %vm450_vm7, %v293_v55, %v842_v27  ;;  %v4213_v14 = vmov 0.0  }
  0x65   : > { %3739 = vmatprep.mubr.msk.bf16.mxu1 %vm182_vm0, %v4675_v18  ;;  %v4685_v38 = vsel %vm452_vm8, %v294_v24, %v843_v51 }
  0x67   : > { %3712 = vmatpush3.bf16.xpose.msra.mxu0 %v550_v26 }
  0x68   : > { %4009 = vmatprep.subr.msk.bf16.mxu0 %vm182_vm0, %v4403_v58 }
  0x6f   : > { %3714 = vmatpush3.bf16.xpose.msra.mxu0 %v553_v54 }
  0x70   : > { %4010 = vmatprep.subr.msk.bf16.mxu0 %vm182_vm0, %v4440_v36 }
  0x77   : > { %3716 = vmatpush3.bf16.xpose.msra.mxu0 %v556_v30 }
  0x78   : > { %4011 = vmatprep.subr.msk.bf16.mxu0 %vm182_vm0, %v4483_v46 }
  0x7f   : > { %3718 = vmatpush3.bf16.xpose.msra.mxu0 %v559_v13 }
  0x80   : > { %4012 = vmatprep.subr.msk.bf16.mxu0 %vm182_vm0, %v4526_v50 }
  0x85   : > { %v671_v61 = vpop.permute.xlu0 %670  ;;  %v673_v9 = vpop.permute.xlu1 %672 }
  0x86   : > { %v706_v60 = vsel %vm182_vm0, %v671_v61, 0  ;;  %v709_v39 = vsel %vm182_vm0, %v673_v9, 0 }
  0x87   : > { %3720 = vmatpush3.bf16.xpose.msra.mxu0 %v562_v31 }
  0x88   : > { %3834 = vmatprep.subr.mxu0 %v4213_v14 }
  0x89   : > { %v687_v55 = vpop.permute.xlu0 %686  ;;  %v689_v12 = vpop.permute.xlu1 %688 }
  0x8a   : > { %4013 = vmatprep.subr.msk.bf16.mxu1 %vm182_vm0, %v687_v55 }
  0x8b   : > { %3724 = vmatpush3.bf16.xpose.msra.mxu1 %v706_v60 }
  0x8c   : > { %4014 = vmatprep.subr.msk.bf16.mxu1 %vm182_vm0, %v689_v12 }
  0x8d   : > { %v691_v41 = vpop.permute.xlu1 %690  ;;  %v675_v63 = vpop.permute.xlu0 %674 }
  0x8e   : > { %v712_v24 = vsel %vm182_vm0, %v675_v63, 0 }
  0x91   : > { %v693_v19 = vpop.permute.xlu1 %692  ;;  %v677_v11 = vpop.permute.xlu0 %676 }
  0x92   : > { %v715_v17 = vsel %vm182_vm0, %v677_v11, 0 }
  0x93   : > { %3726 = vmatpush3.bf16.xpose.msra.mxu1 %v709_v39 }
  0x94   : > { %4015 = vmatprep.subr.msk.bf16.mxu1 %vm182_vm0, %v691_v41 }
  0x98   : > { %v695_v22 = vpop.permute.xlu1 %694 }
  0x99   : > { %v679_v47 = vpop.permute.xlu0 %678 }
  0x9a   : > { %v718_v62 = vsel %vm182_vm0, %v679_v47, 0 }
  0x9b   : > { %3728 = vmatpush3.bf16.xpose.msra.mxu1 %v712_v24 }
  0x9c   : > { %4016 = vmatprep.subr.msk.bf16.mxu1 %vm182_vm0, %v693_v19  ;;  %v697_v49 = vpop.permute.xlu1 %696 }
  0xa2   : > { %v681_v34 = vpop.permute.xlu0 %680 }
  0xa3   : > { %3730 = vmatpush3.bf16.xpose.msra.mxu1 %v715_v17  ;;  %v721_v44 = vsel %vm182_vm0, %v681_v34, 0 }
  0xa4   : > { %4017 = vmatprep.subr.msk.bf16.mxu1 %vm182_vm0, %v695_v22 }
  0xa5   : > { %v699_v35 = vpop.permute.xlu1 %698 }
  0xaa   : > { %v683_v5 = vpop.permute.xlu0 %682 }
  0xab   : > { %3732 = vmatpush3.bf16.xpose.msra.mxu1 %v718_v62  ;;  %v724_v53 = vsel %vm182_vm0, %v683_v5, 0 }
  0xac   : > { %4018 = vmatprep.subr.msk.bf16.mxu1 %vm182_vm0, %v697_v49 }
  0xad   : > { %v701_v32 = vpop.permute.xlu1 %700 }
  0xae   : > { %v685_v10 = vpop.permute.xlu0 %684 }
  0xaf   : > { %v727_v29 = vsel %vm182_vm0, %v685_v10, 0 }
  0xb3   : > { %3734 = vmatpush3.bf16.xpose.msra.mxu1 %v721_v44 }
  0xb4   : > { %4019 = vmatprep.subr.msk.bf16.mxu1 %vm182_vm0, %v699_v35 }
  0xbb   : > { %3736 = vmatpush3.bf16.xpose.msra.mxu1 %v724_v53 }
  0xbc   : > { %4020 = vmatprep.subr.msk.bf16.mxu1 %vm182_vm0, %v701_v32 }
  0xc3   : > { %3738 = vmatpush3.bf16.xpose.msra.mxu1 %v727_v29 }
  0xc4   : > { %3839 = vmatprep.subr.mxu1 %v4213_v14 }
  0xca   : > { %3740 = vmatmul.mubr.msk.bf16.vlgmr.msra.gmra.mrb[0].mxu1 %vm182_vm0, %v4675_v18 }
  0xcb   : > { %3840 = vmatpush3.xpose.msk.msra.mxu1 %vm182_vm0, %v4685_v38  ;;  %3841 = vmatprep.mubr.msk.f32.mxu1 %vm4214_vm9, %v4213_v14 }
  0xcc   : > { %3849 = vmatprep.subr.mxu1 %v4213_v14 }
  0xd1   : > { %v861_v6 = vpop.permute.xlu0 %860 }
  0xd2   : > { %3842 = vmatmul.mubr.msk.f32.vlgmr.msra.gmra.mrb[4].mxu1 %vm182_vm0, %v861_v6 }
  0xd3   : > { %3851 = vmatprep.mubr.msk.f32.mxu1 %vm4214_vm9, %v4213_v14 }
  0xd6   : > { %v456_v37 = vpop.permute.xlu1 %455 }
  0xd7   : > { %3721 = vmatprep.mubr.msk.bf16.mxu0 %vm182_vm0, %v456_v37 }
  0xd8   : > { %3722 = vmatmul.mubr.msk.bf16.vlgmr.msra.gmra.mrb[0].mxu0 %vm182_vm0, %v456_v37 }
  0xd9   : > { %3835 = vmatpush3.xpose.msk.msra.mxu0 %vm182_vm0, %v861_v6  ;;  %3836 = vmatprep.mubr.msk.f32.mxu0 %vm4214_vm9, %v4213_v14 }
  0xda   : > { %3844 = vmatprep.subr.mxu0 %v4213_v14 }
  0xe0   : > { %3837 = vmatmul.mubr.msk.f32.vlgmr.msra.gmra.mrb[4].mxu0 %vm182_vm0, %v4685_v38 }
  0xe1   : > { %3846 = vmatprep.mubr.msk.f32.mxu0 %vm4214_vm9, %v4213_v14 }
 0x19d   : > { %v4741_v15 = vpop.f32.mrb[0].mxu1 }
 0x19e   : > { %v4743_v20 = vpop.f32.mrb[1].mxu1 }
 0x19f   : > { %v791_v8 = vpop.f32.mrb[2].mxu1 }
 0x1a0   : > { %v792_v48 = vpop.f32.mrb[3].mxu1 }
 0x1a5   : > { %v1002_v18 = vpop.f32.mrb[4].mxu1 }
 0x1a6   : > { %v3843_v27 = vpop.f32.mrb[5].mxu1  ;;  %v1026_v26 = vsel %vm1006_vm10, %v1002_v18, -inf }
 0x1a7   : > { %1027 = vmax.xlane.f32.xlu0 %v1026_v26 }
 0x1ab   : > { %v4746_v51 = vpop.f32.mrb[0].mxu0 }
 0x1ac   : > { %v4748_v54 = vpop.f32.mrb[1].mxu0 }
 0x1ad   : > { %v626_v38 = vpop.f32.mrb[2].mxu0  ;;  %v629_v30 = vmax.f32 %v4746_v51, %v4748_v54 }
 0x1ae   : > { %v627_v13 = vpop.f32.mrb[3].mxu0 }
 0x1b3   : > { %v932_v61 = vpop.f32.mrb[4].mxu0 }
 0x1b4   : > { %v1007_v9 = vsel %vm1006_vm10, %v932_v61, -inf  ;;  %v3838_v31 = vpop.f32.mrb[5].mxu0 }
 0x1b5   : > { %v1008_v55 = vrot.slane %v1007_v9, 4 }
 0x1b7   : > { %v1009_v60 = vmax.f32 %v1007_v9, %v1008_v55 }
 0x1b9   : > { %v1010_v12 = vrot.slane %v1009_v60, 2 }
 0x1bb   : > { %v1011_v41 = vmax.f32 %v1009_v60, %v1010_v12 }
 0x1bd   : > { %v1012_v39 = vrot.slane %v1011_v41, 1 }
 0x1bf   : > { %v1013_v63 = vmax.f32 %v1011_v41, %v1012_v39 }
 0x1c1   : > { %v1014_v24 = vsub.f32 %v932_v61, %v1013_v63 }
 0x1c3   : > { %v1015_v19 = vmul.f32 1.442695, %v1014_v24 }
 0x1c5   : > { %4148 = vpow2.f32 %v1015_v19 }
 0x1cf   : > { %v4149_v11 = vpop.eup %4148 }
 0x1d0   : > { %v1017_v17 = vsel %vm1006_vm10, %v4149_v11, 0.0 }
 0x1d1   : > { %v1018_v22 = vrot.slane %v1017_v17, 4 }
 0x1d3   : > { %v1019_v47 = vadd.f32 %v1018_v22, %v1017_v17 }
 0x1d5   : > { %v1020_v62 = vrot.slane %v1019_v47, 2 }
 0x1d7   : > { %v1021_v49 = vadd.f32 %v1020_v62, %v1019_v47 }
 0x1d9   : > { %v1022_v34 = vrot.slane %v1021_v49, 1 }
 0x1db   : > { %v1023_v44 = vadd.f32 %v1022_v34, %v1021_v49  ;;  %v1037_v34 = vlaneseq }
 0x1dd   : > { %4150 = vrcp.f32 %v1023_v44  ;;  %v1038_v44 = vshrl.u32 %v1037_v34, 7 }
 0x1e7   : > { %v4151_v35 = vpop.eup %4150 }
 0x1e8   : > { %v4754_v5 = vmul.f32 %v4151_v35, %v4149_v11  ;;  %v1040_v35 = vand.u32 127, %v1037_v34 }
 0x1ea   : > { %v1047_v53 = vand.u32 2147483647, %v4754_v5  ;;  %vm1041_vm11 = vcmp.eq.s32.totalorder %v1038_v44, %v1040_v35 }
 0x1ec   : > { %v1048_v32 = vsel %vm1006_vm10, %v1047_v53, 0.0 }
 0x1ed   : > { %1058 = vadd.xlane.f32.xlu1 %v1048_v32 }
 0x1fe   : > { %2828 = vrot.lane.b32.xlu1 %v4248_v1, %s4215_s13  ;;  %v1049_v1 = vrot.slane %v1048_v32, 4 }
 0x202   : > { %2830 = vrot.lane.b32.xlu1 %v4285_v16, %s4215_s13 }
 0x206   : > { %2814 = vrot.lane.b32.xlu1 %v4251_v2, %s4215_s13  ;;  %v1050_v2 = vadd.f32 %v1049_v1, %v1048_v32 }
 0x208   : > { %v1051_v29 = vrot.slane %v1050_v2, 2 }
 0x20a   : > { %2816 = vrot.lane.b32.xlu1 %v4334_v43, %s4215_s13 }
 0x20e   : > { %2818 = vrot.lane.b32.xlu1 %v4376_v33, %s4215_s13  ;;  %v1052_v33 = vadd.f32 %v1051_v29, %v1050_v2 }
 0x210   : > { %v1053_v6 = vrot.slane %v1052_v33, 1 }
 0x212   : > { %2820 = vrot.lane.b32.xlu1 %v4427_v21, %s4215_s13  ;;  %v1054_v8 = vadd.f32 %v1053_v6, %v1052_v33 }
 0x216   : > { %2822 = vrot.lane.b32.xlu1 %v4463_v59, %s4215_s13  ;;  %v1055_v59 = vsel %vm1006_vm10, %v1054_v8, -inf }
 0x21a   : > { %2824 = vrot.lane.b32.xlu1 %v4512_v45, %s4215_s13 }
 0x21e   : > { %2826 = vrot.lane.b32.xlu1 %v4557_v28, %s4215_s13 }
 0x234   : > { %v1028_v16 = vpop.xlane.xlu0 %1027 }
 0x235   : > { %v1029_v10 = vsub.f32 %v1002_v18, %v1028_v16 }
 0x237   : > { %v1030_v43 = vmul.f32 1.442695, %v1029_v10 }
 0x239   : > { %4152 = vpow2.f32 %v1030_v43 }
 0x243   : > { %v4153_v37 = vpop.eup %4152 }
 0x244   : > { %v1032_v21 = vsel %vm1006_vm10, %v4153_v37, 0.0 }
 0x245   : > { %1033 = vadd.xlane.f32.xlu0 %v1032_v21 }
 0x249   : > { %1056 = vmax.xlane.f32.xlu0 %v1055_v59 }
 0x25f   : > { %2812 = vrot.lane.b32.xlu0 %v4245_v0, %s4215_s13 }
 0x263   : > { %2832 = vrot.lane.b32.xlu0 %v4304_v25, %s4215_s13 }
 0x267   : > { %2834 = vrot.lane.b32.xlu0 %v4351_v57, %s4215_s13 }
 0x26b   : > { %2836 = vrot.lane.b32.xlu0 %v4403_v58, %s4215_s13 }
 0x26f   : > { %2838 = vrot.lane.b32.xlu0 %v4440_v36, %s4215_s13 }
 0x273   : > { %2840 = vrot.lane.b32.xlu0 %v4483_v46, %s4215_s13 }
 0x277   : > { %2842 = vrot.lane.b32.xlu0 %v4526_v50, %s4215_s13 }
 0x27a   : > { %v1059_v0 = vpop.xlane.xlu1 %1058 }
 0x27b   : > { %v1060_v28 = vrot.slane %v1059_v0, 4 }
 0x27d   : > { %v1061_v45 = vmax.f32 %v1059_v0, %v1060_v28 }
 0x27f   : > { %v1062_v25 = vrot.slane %v1061_v45, 2 }
 0x281   : > { %v1063_v48 = vmax.f32 %v1061_v45, %v1062_v25 }
 0x283   : > { %v1064_v18 = vrot.slane %v1063_v48, 1 }
 0x285   : > { %v1065_v27 = vmax.f32 %v1063_v48, %v1064_v18 }
 0x296   : > { %630 = vmax.xlane.f32.xlu0 %v629_v30 }
 0x2d2   : > { %v1034_v57 = vpop.xlane.xlu0 %1033 }
 0x2d3   : > { %4154 = vrcp.f32 %v1034_v57 }
 0x2d6   : > { %v1057_v58 = vpop.xlane.xlu0 %1056 }
 0x2d7   : > { %v1066_v26 = vmul.f32 %v1065_v27, %v1057_v58 }
 0x2d9   : > { %4156 = vrcp.f32 %v1066_v26 }
 0x2da   : > { %v4797_v50 = vpop.permute.xlu0 %2812 }
 0x2dd   : > { %v4155_v36 = vpop.eup %4154 }
 0x2de   : > { %v1036_v38 = vmul.f32 %v4155_v36, %v4153_v37  ;;  %v4799_v30 = vpop.permute.xlu0 %2832 }
 0x2e2   : > { %v4801_v61 = vpop.permute.xlu0 %2834 }
 0x2e3   : > { %v4157_v13 = vpop.eup %4156 }
 0x2e4   : > { %v1068_v46 = vmul.f32 %v4157_v13, %v1036_v38 }
 0x2e6   : > { %3845 = vmatpush3.msra.mxu0 %v1068_v46  ;;  %v4803_v9 = vpop.permute.xlu0 %2836  ;;  %v1142_v21 = vmul.f32 0.25, %v1068_v46 }
 0x2e7   : > { %3847 = vmatmul.mubr.msk.f32.vlgmr.msra.gmra.mrb[6].mxu0 %vm1006_vm10, %v4754_v5  ;;  %3854 = vmatprep.subr.mxu0 %v4213_v14 }
 0x2e8   : > { %3856 = vmatprep.mubr.msk.f32.mxu0 %vm4214_vm9, %v4213_v14 }
 0x2ea   : > { %v4805_v31 = vpop.permute.xlu0 %2838 }
 0x2ee   : > { %v4807_v55 = vpop.permute.xlu0 %2840 }
 0x2f2   : > { %v4809_v60 = vpop.permute.xlu0 %2842 }
 0x323   : > { %v631_v12 = vpop.xlane.xlu0 %630 }
 0x324   : > { %v632_v41 = vsub.f32 %v4746_v51, %v631_v12  ;;  %v633_v39 = vsub.f32 %v4748_v54, %v631_v12  ;;  %v3595_v51 = vsel %vm1041_vm11, 1.0, %v4213_v14 }
 0x325   : > { %v4814_v54 = vmul.f32 7.0, %v3595_v51  ;;  %v4821_v2 = vmul.f32 15.0, %v3595_v51  ;;  %v4828_v29 = vmul.f32 13.0, %v3595_v51 }
 0x326   : > { %v634_v63 = vmul.f32 1.442695, %v632_v41  ;;  %v636_v24 = vmul.f32 1.442695, %v633_v39 }
 0x328   : > { %4158 = vpow2.f32 %v634_v63 }
 0x329   : > { %4160 = vpow2.f32 %v636_v24 }
 0x332   : > { %v4159_v19 = vpop.eup %4158 }
 0x333   : > { %v4161_v11 = vpop.eup %4160  ;;  %v638_v17 = vpack.c.bf16 %v4159_v19, %v4159_v19 }
 0x334   : > { %v639_v22 = vpack.c.bf16 %v4161_v11, %v4161_v11 }
 0x335   : > { %2975 = vxpose.xlu0.c.b16.start.end [1/1] (short) %v638_v17, 128  ;;  %v640_v47 = vunpack.c.l.bf16 %v638_v17 }
 0x336   : > { %v641_v62 = vunpack.c.l.bf16 %v639_v22 }
 0x338   : > { %v642_v49 = vadd.f32 %v641_v62, %v640_v47 }
 0x33a   : > { %643 = vadd.xlane.f32.xlu1 %v642_v49 }
 0x367   : > { %2991 = vxpose.xlu1.c.b16.start.end [1/1] (short) %v639_v22, 128 }
 0x3ba   : > { %v1138_v53 = vpop.f32.mrb[6].mxu0 }
 0x3bb   : > { %v1143_v32 = vsub.f32 %v4814_v54, %v1138_v53  ;;  %v3848_v1 = vpop.f32.mrb[7].mxu0 }
 0x3bd   : > { %3850 = vmatpush3.msra.mxu1 %v1143_v32 }
 0x3be   : > { %3852 = vmatmul.mubr.msk.f32.vlgmr.msra.gmra.mrb[6].mxu1 %vm1006_vm10, %v1138_v53  ;;  %3859 = vmatprep.subr.mxu1 %v4213_v14 }
 0x3bf   : > { %3861 = vmatprep.mubr.msk.f32.mxu1 %vm4214_vm9, %v4213_v14 }
 0x491   : > { %v1213_v16 = vpop.f32.mrb[6].mxu1 }
 0x492   : > { %v1217_v10 = vsub.f32 %v4821_v2, %v1213_v16  ;;  %v3853_v43 = vpop.f32.mrb[7].mxu1 }
 0x494   : > { %3855 = vmatpush3.msra.mxu0 %v1217_v10 }
 0x495   : > { %3857 = vmatmul.mubr.msk.f32.vlgmr.msra.gmra.mrb[8].mxu0 %vm1006_vm10, %v1138_v53  ;;  %3864 = vmatprep.subr.mxu0 %v4213_v14 }
 0x496   : > { %3866 = vmatprep.mubr.msk.f32.mxu0 %vm4214_vm9, %v4213_v14 }
 0x568   : > { %v1284_v33 = vpop.f32.mrb[8].mxu0 }
 0x569   : > { %v1288_v6 = vsub.f32 %v4828_v29, %v1284_v33  ;;  %v3858_v37 = vpop.f32.mrb[9].mxu0 }
 0x56b   : > { %3860 = vmatpush3.msra.mxu1 %v1288_v6 }
 0x56c   : > { %3862 = vmatmul.mubr.msk.f32.vlgmr.msra.gmra.mrb[8].mxu1 %vm1006_vm10, %v1142_v21  ;;  %3869 = vmatprep.subr.mxu1 %v4213_v14 }
 0x56d   : > { %3871 = vmatprep.mubr.msk.f32.mxu1 %vm4214_vm9, %v4213_v14 }
 0x63f   : > { %v1358_v8 = vpop.f32.mrb[8].mxu1 }
 0x640   : > { %v3863_v59 = vpop.f32.mrb[9].mxu1  ;;  %3865 = vmatpush3.msra.mxu0 %v1358_v8  ;;  %v1432_v26 = vmul.f32 0.25, %v1358_v8 }
 0x641   : > { %3867 = vmatmul.mubr.msk.f32.vlgmr.msra.gmra.mrb[10].mxu0 %vm1006_vm10, %v4754_v5  ;;  %3874 = vmatprep.subr.mxu0 %v4213_v14 }
 0x642   : > { %3876 = vmatprep.mubr.msk.f32.mxu0 %vm4214_vm9, %v4213_v14 }
 0x714   : > { %v1428_v0 = vpop.f32.mrb[10].mxu0 }
 0x715   : > { %v1433_v28 = vsub.f32 %v4814_v54, %v1428_v0  ;;  %v3868_v45 = vpop.f32.mrb[11].mxu0 }
 0x717   : > { %3870 = vmatpush3.msra.mxu1 %v1433_v28 }
 0x718   : > { %3872 = vmatmul.mubr.msk.f32.vlgmr.msra.gmra.mrb[10].mxu1 %vm1006_vm10, %v1428_v0  ;;  %3879 = vmatprep.subr.mxu1 %v4213_v14 }
 0x719   : > { %3881 = vmatprep.mubr.msk.f32.mxu1 %vm4214_vm9, %v4213_v14 }
 0x7eb   : > { %v1503_v25 = vpop.f32.mrb[10].mxu1 }
 0x7ec   : > { %v1507_v48 = vsub.f32 %v4821_v2, %v1503_v25  ;;  %v3873_v18 = vpop.f32.mrb[11].mxu1 }
 0x7ee   : > { %3875 = vmatpush3.msra.mxu0 %v1507_v48 }
 0x7ef   : > { %3877 = vmatmul.mubr.msk.f32.vlgmr.msra.gmra.mrb[12].mxu0 %vm1006_vm10, %v1428_v0  ;;  %3884 = vmatprep.subr.mxu0 %v4213_v14 }
 0x7f0   : > { %3886 = vmatprep.mubr.msk.f32.mxu0 %vm4214_vm9, %v4213_v14 }
 0x8c2   : > { %v1574_v57 = vpop.f32.mrb[12].mxu0 }
 0x8c3   : > { %v1578_v27 = vsub.f32 %v4828_v29, %v1574_v57  ;;  %v3878_v58 = vpop.f32.mrb[13].mxu0 }
 0x8c5   : > { %3880 = vmatpush3.msra.mxu1 %v1578_v27 }
 0x8c6   : > { %3882 = vmatmul.mubr.msk.f32.vlgmr.msra.gmra.mrb[12].mxu1 %vm1006_vm10, %v1432_v26  ;;  %3889 = vmatprep.subr.mxu1 %v4213_v14  ;;  %v800_v26 = vrot.slane %v4743_v20, 4 }
 0x8c7   : > { %3891 = vmatprep.mubr.msk.f32.mxu1 %vm4214_vm9, %v4213_v14 }
 0x999   : > { %v1648_v36 = vpop.f32.mrb[12].mxu1 }
 0x99a   : > { %v3883_v38 = vpop.f32.mrb[13].mxu1  ;;  %3885 = vmatpush3.msra.mxu0 %v1648_v36  ;;  %v1722_v17 = vmul.f32 0.25, %v1648_v36 }
 0x99b   : > { %3887 = vmatmul.mubr.msk.f32.vlgmr.msra.gmra.mrb[14].mxu0 %vm1006_vm10, %v4754_v5  ;;  %3894 = vmatprep.subr.mxu0 %v4213_v14 }
 0x99c   : > { %3896 = vmatprep.mubr.msk.f32.mxu0 %vm4214_vm9, %v4213_v14 }
 0xa6e   : > { %v1718_v13 = vpop.f32.mrb[14].mxu0 }
 0xa6f   : > { %v1723_v46 = vsub.f32 %v4814_v54, %v1718_v13  ;;  %v3888_v12 = vpop.f32.mrb[15].mxu0 }
 0xa71   : > { %3890 = vmatpush3.msra.mxu1 %v1723_v46 }
 0xa72   : > { %3892 = vmatmul.mubr.msk.f32.vlgmr.msra.gmra.mrb[14].mxu1 %vm1006_vm10, %v1718_v13  ;;  %3899 = vmatprep.subr.mxu1 %v4213_v14 }
 0xa73   : > { %3901 = vmatprep.mubr.msk.f32.mxu1 %vm4214_vm9, %v4213_v14 }
 0xb45   : > { %v1793_v41 = vpop.f32.mrb[14].mxu1 }
 0xb46   : > { %v1797_v39 = vsub.f32 %v4821_v2, %v1793_v41  ;;  %v3893_v63 = vpop.f32.mrb[15].mxu1  ;;  %v794_v41 = vrot.slane %v4741_v15, 4 }
 0xb48   : > { %3895 = vmatpush3.msra.mxu0 %v1797_v39  ;;  %v795_v39 = vmax.f32 %v4741_v15, %v794_v41 }
 0xb49   : > { %3897 = vmatmul.mubr.msk.f32.vlgmr.msra.gmra.mrb[16].mxu0 %vm1006_vm10, %v1718_v13  ;;  %3904 = vmatprep.subr.mxu0 %v4213_v14 }
 0xb4a   : > { %3906 = vmatprep.mubr.msk.f32.mxu0 %vm4214_vm9, %v4213_v14  ;;  %v796_v63 = vrot.slane %v795_v39, 2 }
 0xc1c   : > { %v1864_v24 = vpop.f32.mrb[16].mxu0 }
 0xc1d   : > { %v1868_v19 = vsub.f32 %v4828_v29, %v1864_v24  ;;  %v3898_v11 = vpop.f32.mrb[17].mxu0 }
 0xc1f   : > { %3900 = vmatpush3.msra.mxu1 %v1868_v19  ;;  %v797_v19 = vmax.f32 %v795_v39, %v796_v63  ;;  %v4041_v39 = vpack.i.bf16 %v4266_v7, %v4298_v23  ;;  %v4046_v63 = vpack.i.bf16 %v4348_v56, %v4345_v52  ;;  %v5145_v23 = vld [vmem:[#allocation20_spill] sm:$0xff] }
 0xc20   : > { %3902 = vmatmul.mubr.msk.f32.vlgmr.msra.gmra.mrb[16].mxu1 %vm1006_vm10, %v1722_v17  ;;  %3909 = vmatprep.subr.mxu1 %v4213_v14  ;;  %v5147_v56 = vld [vmem:[#allocation24_spill] sm:$0xff] }
 0xc21   : > { %3911 = vmatprep.mubr.msk.f32.mxu1 %vm4214_vm9, %v4213_v14  ;;  %v798_v17 = vrot.slane %v797_v19, 1  ;;  %4042 = vrot.lane.b32.xlu1 %v4041_v39, %s4215_s13 }
 0xcf3   : > { %v1938_v22 = vpop.f32.mrb[16].mxu1 }
 0xcf4   : > { %v3903_v47 = vpop.f32.mrb[17].mxu1  ;;  %3905 = vmatpush3.msra.mxu0 %v1938_v22  ;;  %v2012_v16 = vmul.f32 0.25, %v1938_v22 }
 0xcf5   : > { %3907 = vmatmul.mubr.msk.f32.vlgmr.msra.gmra.mrb[18].mxu0 %vm1006_vm10, %v4754_v5  ;;  %3914 = vmatprep.subr.mxu0 %v4213_v14  ;;  %v799_v47 = vmax.f32 %v797_v19, %v798_v17  ;;  %v5141_v19 = vld [vmem:[#allocation12_spill] sm:$0xff]  ;;  %v5144_v17 = vld [vmem:[#allocation17_spill] sm:$0xff] }
 0xcf6   : > { %3916 = vmatprep.mubr.msk.f32.mxu0 %vm4214_vm9, %v4213_v14 }
 0xdc8   : > { %v2008_v62 = vpop.f32.mrb[18].mxu0 }
 0xdc9   : > { %v2013_v49 = vsub.f32 %v4814_v54, %v2008_v62  ;;  %v3908_v34 = vpop.f32.mrb[19].mxu0 }
 0xdcb   : > { %3910 = vmatpush3.msra.mxu1 %v2013_v49  ;;  %v806_v49 = vsub.f32 %v4741_v15, %v799_v47  ;;  %v5148_v47 = vld [vmem:[#allocation25_spill] sm:$0xff] }
 0xdcc   : > { %3912 = vmatmul.mubr.msk.f32.vlgmr.msra.gmra.mrb[18].mxu1 %vm1006_vm10, %v2008_v62  ;;  %3919 = vmatprep.subr.mxu1 %v4213_v14 }
 0xdcd   : > { %3921 = vmatprep.mubr.msk.f32.mxu1 %vm4214_vm9, %v4213_v14 }
 0xe9f   : > { %v2083_v44 = vpop.f32.mrb[18].mxu1 }
 0xea0   : > { %v2087_v35 = vsub.f32 %v4821_v2, %v2083_v44  ;;  %v3913_v51 = vpop.f32.mrb[19].mxu1  ;;  %v808_v44 = vmul.f32 1.442695, %v806_v49 }
 0xea1   : > { %v2829_v51 = vpop.permute.xlu1 %2828 }
 0xea2   : > { %3915 = vmatpush3.msra.mxu0 %v2087_v35 }
 0xea3   : > { %3917 = vmatmul.mubr.msk.f32.vlgmr.msra.gmra.mrb[20].mxu0 %vm1006_vm10, %v2008_v62  ;;  %3924 = vmatprep.subr.mxu0 %v4213_v14 }
 0xea4   : > { %3926 = vmatprep.mubr.msk.f32.mxu0 %vm4214_vm9, %v4213_v14 }
 0xf76   : > { %v2154_v53 = vpop.f32.mrb[20].mxu0 }
 0xf77   : > { %v2158_v32 = vsub.f32 %v4828_v29, %v2154_v53  ;;  %v3918_v1 = vpop.f32.mrb[21].mxu0 }
 0xf79   : > { %3920 = vmatpush3.msra.mxu1 %v2158_v32  ;;  %v2831_v32 = vpop.permute.xlu1 %2830 }
 0xf7a   : > { %3922 = vmatmul.mubr.msk.f32.vlgmr.msra.gmra.mrb[20].mxu1 %vm1006_vm10, %v2012_v16  ;;  %3929 = vmatprep.subr.mxu1 %v4213_v14 }
 0xf7b   : > { %3931 = vmatprep.mubr.msk.f32.mxu1 %vm4214_vm9, %v4213_v14 }
0x104d   : > { %v2228_v10 = vpop.f32.mrb[20].mxu1 }
0x104e   : > { %v3923_v43 = vpop.f32.mrb[21].mxu1  ;;  %3925 = vmatpush3.msra.mxu0 %v2228_v10  ;;  %v2302_v25 = vmul.f32 0.25, %v2228_v10  ;;  %v2815_v10 = vpop.permute.xlu1 %2814 }
0x104f   : > { %3927 = vmatmul.mubr.msk.f32.vlgmr.msra.gmra.mrb[22].mxu0 %vm1006_vm10, %v4754_v5  ;;  %3934 = vmatprep.subr.mxu0 %v4213_v14 }
0x1050   : > { %3936 = vmatprep.mubr.msk.f32.mxu0 %vm4214_vm9, %v4213_v14 }
0x1052   : > { %v2817_v15 = vpop.permute.xlu1 %2816 }
0x1122   : > { %v2298_v33 = vpop.f32.mrb[22].mxu0 }
0x1123   : > { %v2303_v6 = vsub.f32 %v4814_v54, %v2298_v33  ;;  %v3928_v37 = vpop.f32.mrb[23].mxu0 }
0x1125   : > { %3930 = vmatpush3.msra.mxu1 %v2303_v6 }
0x1126   : > { %3932 = vmatmul.mubr.msk.f32.vlgmr.msra.gmra.mrb[22].mxu1 %vm1006_vm10, %v2298_v33  ;;  %3939 = vmatprep.subr.mxu1 %v4213_v14 }
0x1127   : > { %3941 = vmatprep.mubr.msk.f32.mxu1 %vm4214_vm9, %v4213_v14 }
0x11f9   : > { %v2373_v21 = vpop.f32.mrb[22].mxu1 }
0x11fa   : > { %v2377_v8 = vsub.f32 %v4821_v2, %v2373_v21  ;;  %v3933_v59 = vpop.f32.mrb[23].mxu1 }
0x11fc   : > { %3935 = vmatpush3.msra.mxu0 %v2377_v8 }
0x11fd   : > { %3937 = vmatmul.mubr.msk.f32.vlgmr.msra.gmra.mrb[24].mxu0 %vm1006_vm10, %v2298_v33  ;;  %3944 = vmatprep.subr.mxu0 %v4213_v14 }
0x11fe   : > { %3946 = vmatprep.mubr.msk.f32.mxu0 %vm4214_vm9, %v4213_v14 }
0x12d0   : > { %v2444_v0 = vpop.f32.mrb[24].mxu0 }
0x12d1   : > { %v2448_v28 = vsub.f32 %v4828_v29, %v2444_v0  ;;  %v3938_v45 = vpop.f32.mrb[25].mxu0 }
0x12d3   : > { %3940 = vmatpush3.msra.mxu1 %v2448_v28  ;;  %v2819_v28 = vpop.permute.xlu1 %2818 }
0x12d4   : > { %3942 = vmatmul.mubr.msk.f32.vlgmr.msra.gmra.mrb[24].mxu1 %vm1006_vm10, %v2302_v25  ;;  %3949 = vmatprep.subr.mxu1 %v4213_v14 }
0x12d5   : > { %3951 = vmatprep.mubr.msk.f32.mxu1 %vm4214_vm9, %v4213_v14 }
0x12d7   : > { %v2821_v25 = vpop.permute.xlu1 %2820 }
0x13a7   : > { %v4915_v48 = vpop.f32.mrb[24].mxu1 }
0x13a8   : > { %v3943_v18 = vpop.f32.mrb[25].mxu1  ;;  %3945 = vmatpush3.msra.mxu0 %v4915_v48 }
0x13a9   : > { %3947 = vmatmul.mubr.msk.f32.vlgmr.msra.gmra.mrb[26].mxu0 %vm1006_vm10, %v4754_v5  ;;  %3954 = vmatprep.subr.mxu0 %v4213_v14  ;;  %v801_v5 = vmax.f32 %v4743_v20, %v800_v26  ;;  %v2823_v18 = vpop.permute.xlu1 %2822 }
0x13aa   : > { %3956 = vmatprep.mubr.msk.f32.mxu0 %vm4214_vm9, %v4213_v14 }
0x13ab   : > { %v802_v36 = vrot.slane %v801_v5, 2 }
0x13ad   : > { %v803_v38 = vmax.f32 %v801_v5, %v802_v36  ;;  %v2592_v5 = vmul.f32 0.25, %v4915_v48 }
0x13af   : > { %v804_v13 = vrot.slane %v803_v38, 1 }
0x13b1   : > { %v805_v46 = vmax.f32 %v803_v38, %v804_v13  ;;  %v2983_v13 = vpop.trf.xlu0 }
0x13b3   : > { %v807_v12 = vsub.f32 %v4743_v20, %v805_v46 }
0x13b5   : > { %v2984_v48 = vpop.trf.xlu0 }
0x147c   : > { %v2588_v57 = vpop.f32.mrb[26].mxu0 }
0x147d   : > { %v2593_v27 = vsub.f32 %v4814_v54, %v2588_v57  ;;  %v3948_v58 = vpop.f32.mrb[27].mxu0  ;;  %v810_v54 = vmul.f32 1.442695, %v807_v12  ;;  %v2985_v12 = vpop.trf.xlu0 }
0x147f   : > { %3950 = vmatpush3.msra.mxu1 %v2593_v27  ;;  %4162 = vpow2.f32 %v810_v54 }
0x1480   : > { %3952 = vmatmul.mubr.msk.f32.vlgmr.msra.gmra.mrb[26].mxu1 %vm1006_vm10, %v2588_v57  ;;  %3959 = vmatprep.subr.mxu1 %v4213_v14  ;;  %4164 = vpow2.f32 %v808_v44  ;;  %v5152_v44 = vld [vmem:[#allocation5_spill] sm:$0xff] }
0x1481   : > { %3961 = vmatprep.mubr.msk.f32.mxu1 %vm4214_vm9, %v4213_v14  ;;  %v2986_v54 = vpop.trf.xlu0 }
0x1485   : > { %v2987_v41 = vpop.trf.xlu0 }
0x1489   : > { %v4163_v24 = vpop.eup %4162 }
0x148a   : > { %v818_v11 = vrot.slane %v4163_v24, 4  ;;  %v4165_v53 = vpop.eup %4164 }
0x148b   : > { %v812_v1 = vrot.slane %v4165_v53, 4 }
0x148c   : > { %v819_v22 = vadd.f32 %v4163_v24, %v818_v11  ;;  %v5142_v11 = vld [vmem:[#allocation13_spill] sm:$0xff] }
0x148d   : > { %v813_v43 = vadd.f32 %v4165_v53, %v812_v1  ;;  %v5156_v1 = vld [vmem:[#allocation9_spill] sm:$0xff] }
0x148e   : > { %v820_v62 = vrot.slane %v819_v22, 2 }
0x148f   : > { %v814_v8 = vrot.slane %v813_v43, 2 }
0x1490   : > { %v821_v34 = vadd.f32 %v820_v62, %v819_v22  ;;  %v5146_v22 = vld [vmem:[#allocation21_spill] sm:$0xff]  ;;  %v5150_v62 = vld [vmem:[#allocation3_spill] sm:$0xff] }
0x1491   : > { %v815_v0 = vadd.f32 %v814_v8, %v813_v43  ;;  %v4066_v52 = vpack.i.bf16 %v5146_v22, %v5145_v23  ;;  %v5158_v43 = vld [vmem:[#allocation11_spill] sm:$0xff]  ;;  %v5161_v8 = vld [vmem:[#allocation18_spill] sm:$0xff] }
0x1492   : > { %v822_v35 = vrot.slane %v821_v34, 1 }
0x1493   : > { %v816_v45 = vrot.slane %v815_v0, 1 }
0x1494   : > { %v823_v20 = vadd.f32 %v822_v35, %v821_v34  ;;  %v5151_v34 = vld [vmem:[#allocation4_spill] sm:$0xff] }
0x1495   : > { %v4081_v35 = vpack.i.bf16 %v5152_v44, %v5151_v34 }
0x1496   : > { %4166 = vrcp.f32 %v823_v20  ;;  %v5153_v20 = vld [vmem:[#allocation6_spill] sm:$0xff] }
0x14a0   : > { %v4167_v16 = vpop.eup %4166 }
0x14a1   : > { %v827_v33 = vmul.f32 %v4167_v16, %v4163_v24  ;;  %v4051_v24 = vpack.i.bf16 %v4388_v42, %v4381_v40  ;;  %v4071_v40 = vpack.i.bf16 %v5148_v47, %v5147_v56  ;;  %v5149_v42 = vld [vmem:[#allocation2_spill] sm:$0xff] }
0x14a2   : > { %v4076_v49 = vpack.i.bf16 %v5150_v62, %v5149_v42 }
0x14a3   : > { %v829_v59 = vpack.c.bf16 %v827_v33, %v827_v33  ;;  %4052 = vrot.lane.b32.xlu1 %v4051_v24, %s4215_s13 }
0x1553   : > { %v2663_v6 = vpop.f32.mrb[26].mxu1 }
0x1554   : > { %v2667_v37 = vsub.f32 %v4821_v2, %v2663_v6  ;;  %v3953_v21 = vpop.f32.mrb[27].mxu1  ;;  %v817_v2 = vadd.f32 %v816_v45, %v815_v0  ;;  %v5159_v6 = vld [vmem:[#allocation14_spill] sm:$0xff] }
0x1555   : > { %v5163_v0 = vld [vmem:[#allocation22_spill] sm:$0xff] }
0x1556   : > { %3955 = vmatpush3.msra.mxu0 %v2667_v37  ;;  %4168 = vrcp.f32 %v817_v2  ;;  %v5160_v37 = vld [vmem:[#allocation15_spill] sm:$0xff] }
0x1557   : > { %3957 = vmatmul.mubr.msk.f32.vlgmr.msra.gmra.mrb[28].mxu0 %vm1006_vm10, %v2588_v57  ;;  %3793 = vmatprep.subr.bf16.mxu0 %v2829_v51  ;;  %v5154_v51 = vld [vmem:[#allocation7_spill] sm:$0xff]  ;;  %v4101_v21 = vpack.i.bf16 %v5160_v37, %v5159_v6 }
0x1558   : > { %3794 = vmatpush3.bf16.msra.mxu0 %v4797_v50  ;;  %2892 = vmatprep.mubr.bf16.mxu0 %v829_v59  ;;  %v2825_v50 = vpop.permute.xlu1 %2824 }
0x1559   : > { %3795 = vmatprep.subr.bf16.mxu0 %v2831_v32  ;;  %v5155_v32 = vld [vmem:[#allocation8_spill] sm:$0xff] }
0x155a   : > { %v4091_v16 = vpack.i.bf16 %v5156_v1, %v5155_v32 }
0x155c   : > { %3796 = vmatpush3.bf16.msra.mxu0 %v2815_v10  ;;  %v2827_v27 = vpop.permute.xlu1 %2826  ;;  %v5157_v10 = vld [vmem:[#allocation10_spill] sm:$0xff] }
0x155d   : > { %3797 = vmatprep.subr.bf16.mxu0 %v4799_v30  ;;  %v4096_v33 = vpack.i.bf16 %v5158_v43, %v5157_v10 }
0x1560   : > { %3798 = vmatpush3.bf16.msra.mxu0 %v2817_v15  ;;  %v4169_v57 = vpop.eup %4168  ;;  %v5162_v15 = vld [vmem:[#allocation19_spill] sm:$0xff]  ;;  %v644_v2 = vpop.xlane.xlu1 %643 }
0x1561   : > { %3799 = vmatprep.subr.bf16.mxu0 %v4801_v61  ;;  %v826_v30 = vmul.f32 %v4169_v57, %v4165_v53  ;;  %v4086_v53 = vpack.i.bf16 %v5154_v51, %v5153_v20  ;;  %v4106_v59 = vpack.i.bf16 %v5162_v15, %v5161_v8  ;;  %4170 = vrcp.f32 %v644_v2 }
0x1563   : > { %v828_v61 = vpack.c.bf16 %v826_v30, %v826_v30  ;;  %v2988_v30 = vpop.trf.xlu0 }
0x1564   : > { %3800 = vmatpush3.bf16.msra.mxu0 %v2819_v28  ;;  %v5164_v28 = vld [vmem:[#allocation23_spill] sm:$0xff] }
0x1565   : > { %3801 = vmatprep.subr.bf16.mxu0 %v4803_v9  ;;  %v4111_v45 = vpack.i.bf16 %v5164_v28, %v5163_v0 }
0x1568   : > { %3802 = vmatpush3.bf16.msra.mxu0 %v2821_v25 }
0x1569   : > { %3803 = vmatprep.subr.bf16.mxu0 %v4805_v31 }
0x156b   : > { %v4171_v25 = vpop.eup %4170 }
0x156c   : > { %3804 = vmatpush3.bf16.msra.mxu0 %v2823_v18 }
0x156d   : > { %3805 = vmatprep.subr.bf16.mxu0 %v4807_v55 }
0x1570   : > { %3806 = vmatpush3.bf16.msra.mxu0 %v2825_v50 }
0x1571   : > { %3807 = vmatprep.subr.bf16.mxu0 %v4809_v60 }
0x1574   : > { %3808 = vmatpush3.bf16.msra.mxu0 %v2827_v27 }
0x1577   : > { %2893 = vmatmul.mubr.bf16.vlgmr.msra.gmra.mrb[32].mxu0 %v828_v61  ;;  %v2999_v61 = vpop.trf.xlu1 }
0x1578   : > { %3971 = vmatprep.mubr.msk.bf16.mxu0 %vm1006_vm10, %v2983_v13 }
0x162a   : > { %v2734_v58 = vpop.f32.mrb[28].mxu0 }
0x162b   : > { %v2738_v9 = vsub.f32 %v4828_v29, %v2734_v58  ;;  %v3958_v26 = vpop.f32.mrb[29].mxu0 }
0x162c   : > { %v3000_v26 = vpop.trf.xlu1 }
0x162d   : > { %3960 = vmatpush3.msra.mxu1 %v2738_v9  ;;  %v2989_v9 = vpop.trf.xlu0 }
0x162e   : > { %3962 = vmatmul.mubr.msk.f32.vlgmr.msra.gmra.mrb[28].mxu1 %vm1006_vm10, %v2592_v5  ;;  %3964 = vmatprep.subr.mxu1 %v4213_v14 }
0x162f   : > { %3966 = vmatprep.mubr.msk.f32.mxu1 %vm4214_vm9, %v4213_v14  ;;  %v4036_v14 = vpack.i.bf16 %v4254_v3, %v4257_v4  ;;  %v4056_v3 = vpack.i.bf16 %v5142_v11, %v5141_v19  ;;  %v5143_v4 = vld [vmem:[#allocation16_spill] sm:$0xff] }
0x1630   : > { %v4061_v7 = vpack.i.bf16 %v5144_v17, %v5143_v4 }
0x1631   : > { %4037 = vrot.lane.b32.xlu0 %v4036_v14, %s4215_s13  ;;  %v2990_v5 = vpop.trf.xlu0 }
0x1632   : > { %4062 = vrot.lane.b32.xlu1 %v4061_v7, %s4215_s13 }
0x1635   : > { %4047 = vrot.lane.b32.xlu0 %v4046_v63, %s4215_s13 }
0x1636   : > { %4072 = vrot.lane.b32.xlu1 %v4071_v40, %s4215_s13 }
0x1639   : > { %4057 = vrot.lane.b32.xlu0 %v4056_v3, %s4215_s13 }
0x163a   : > { %4082 = vrot.lane.b32.xlu1 %v4081_v35, %s4215_s13 }
0x163d   : > { %4067 = vrot.lane.b32.xlu0 %v4066_v52, %s4215_s13 }
0x163e   : > { %4092 = vrot.lane.b32.xlu1 %v4091_v16, %s4215_s13 }
0x1641   : > { %4077 = vrot.lane.b32.xlu0 %v4076_v49, %s4215_s13 }
0x1642   : > { %4102 = vrot.lane.b32.xlu1 %v4101_v21, %s4215_s13 }
0x1645   : > { %4087 = vrot.lane.b32.xlu0 %v4086_v53, %s4215_s13 }
0x1646   : > { %4112 = vrot.lane.b32.xlu1 %v4111_v45, %s4215_s13 }
0x1649   : > { %4097 = vrot.lane.b32.xlu0 %v4096_v33, %s4215_s13 }
0x164a   : > { %v3809_v31 = vpop.f32.mrb[32].mxu0 }
0x164b   : > { %v3810_v55 = vpop.f32.mrb[33].mxu0 }
0x164c   : > { %v3811_v60 = vadd.f32 %v3810_v55, %v3809_v31  ;;  %v3812_v36 = vpop.f32.mrb[34].mxu0  ;;  %v3001_v31 = vpop.trf.xlu1 }
0x164d   : > { %v3813_v38 = vpop.f32.mrb[35].mxu0  ;;  %4107 = vrot.lane.b32.xlu0 %v4106_v59, %s4215_s13 }
0x164e   : > { %3965 = vmatpush3.msra.mxu1 %v3811_v60 }
0x1650   : > { %v3002_v55 = vpop.trf.xlu1 }
0x1654   : > { %v3003_v60 = vpop.trf.xlu1 }
0x1658   : > { %v3004_v36 = vpop.trf.xlu1 }
0x165c   : > { %v3005_v38 = vpop.trf.xlu1 }
0x1660   : > { %v3006_v13 = vpop.trf.xlu1 }
0x1701   : > { %v2808_v29 = vpop.f32.mrb[28].mxu1 }
0x1702   : > { %v3963_v46 = vpop.f32.mrb[29].mxu1  ;;  %3967 = vmatmul.mubr.msk.f32.vlgmr.msra.gmra.mrb[30].mxu1 %vm1006_vm10, %v2808_v29  ;;  %v4043_v29 = vpop.permute.xlu1 %4042 }
0x1703   : > { %3979 = vmatprep.mubr.msk.bf16.mxu1 %vm1006_vm10, %v2987_v41  ;;  %v4038_v46 = vpop.permute.xlu0 %4037 }
0x17d5   : > { %v2969_v18 = vpop.f32.mrb[30].mxu1 }
0x17d6   : > { %v2973_v50 = vmul.f32 %v4171_v25, %v2969_v18  ;;  %v3968_v57 = vpop.f32.mrb[31].mxu1 }
0x17d8   : > { %v2974_v27 = vpack.c.bf16 %v2973_v50, %v2973_v50 }
0x17da   : > { %4021 = vmatprep.subr.msk.bf16.mxu0 %vm3183_vm12, %v2974_v27  ;;  %4022 = vmatprep.subr.msk.bf16.mxu1 %vm3183_vm12, %v2974_v27  ;;  %v3185_v58 = vsel %vm3183_vm12, %v2974_v27, 0 }
0x17db   : > { %3970 = vmatpush3.bf16.msra.mxu0 %v3185_v58  ;;  %4004 = vmatpush3.bf16.msra.mxu1 %v3185_v58 }
0x17de   : > { %3972 = vmatmul.mubr.msk.bf16.vlgmr.msra.gmra.mrb[36].mxu0 %vm1006_vm10, %v2984_v48  ;;  %3980 = vmatmul.mubr.msk.bf16.vlgmr.msra.gmra.mrb[32].mxu1 %vm1006_vm10, %v2988_v30  ;;  %v4053_v48 = vpop.permute.xlu1 %4052 }
0x17df   : > { %3975 = vmatprep.mubr.msk.bf16.mxu0 %vm1006_vm10, %v2985_v12  ;;  %3983 = vmatprep.mubr.msk.bf16.mxu1 %vm1006_vm10, %v2989_v9  ;;  %v4048_v12 = vpop.permute.xlu0 %4047 }
0x17e3   : > { %v4058_v41 = vpop.permute.xlu0 %4057 }
0x17e6   : > { %3976 = vmatmul.mubr.msk.bf16.gmra.mrb[40].mxu0 %vm1006_vm10, %v2986_v54  ;;  %3984 = vmatmul.mubr.msk.bf16.gmra.mrb[36].mxu1 %vm1006_vm10, %v2990_v5  ;;  %v4063_v54 = vpop.permute.xlu1 %4062 }
0x17e7   : > { %3987 = vmatprep.mubr.msk.bf16.mxu1 %vm1006_vm10, %v2999_v61  ;;  %v4068_v14 = vpop.permute.xlu0 %4067 }
0x17ea   : > { %v4073_v39 = vpop.permute.xlu1 %4072 }
0x17eb   : > { %v4078_v1 = vpop.permute.xlu0 %4077 }
0x17ee   : > { %3988 = vmatmul.mubr.msk.bf16.gmra.mrb[40].mxu1 %vm1006_vm10, %v3000_v26  ;;  %v4083_v16 = vpop.permute.xlu1 %4082 }
0x17ef   : > { %3991 = vmatprep.mubr.msk.bf16.mxu1 %vm1006_vm10, %v3001_v31 }
0x17f6   : > { %3992 = vmatmul.mubr.msk.bf16.gmra.mrb[44].mxu1 %vm1006_vm10, %v3002_v55 }
0x17f7   : > { %3995 = vmatprep.mubr.msk.bf16.mxu1 %vm1006_vm10, %v3003_v60 }
0x17fe   : > { %3996 = vmatmul.mubr.msk.bf16.gmra.mrb[48].mxu1 %vm1006_vm10, %v3004_v36 }
0x17ff   : > { %3999 = vmatprep.mubr.msk.bf16.mxu1 %vm1006_vm10, %v3005_v38 }
0x1806   : > { %4000 = vmatmul.mubr.msk.bf16.gmra.mrb[52].mxu1 %vm1006_vm10, %v3006_v13  ;;  %v4093_v13 = vpop.permute.xlu1 %4092 }
0x18b1   : > { %v3973_v63 = vpop.f32.mrb[36].mxu0  ;;  %v3981_v24 = vpop.f32.mrb[32].mxu1 }
0x18b2   : > { %v4172_v19 = vadd.low.f32.bf16 %v3973_v63, %v4043_v29  ;;  %v4173_v11 = vadd.low.f32.bf16 %v3981_v24, %v4063_v54  ;;  %v3221_v3 = vpop.f32.mrb[37].mxu0  ;;  %v3253_v4 = vpop.f32.mrb[33].mxu1 }
0x18b3   : > { %v4174_v17 = vadd.low.f32.bf16 %v3221_v3, %v4038_v46  ;;  %v4175_v7 = vadd.low.f32.bf16 %v3253_v4, %v4058_v41  ;;  %v3974_v23 = vpop.f32.mrb[38].mxu0  ;;  %v3982_v22 = vpop.f32.mrb[34].mxu1 }
0x18b4   : > { %v3675_v52 = vpack.c.bf16 %v4172_v19, %v4172_v19  ;;  %v3683_v56 = vpack.c.bf16 %v4173_v11, %v4173_v11  ;;  %v4176_v47 = vadd.high.f32.bf16 %v3974_v23, %v4043_v29  ;;  %v4177_v40 = vadd.high.f32.bf16 %v3982_v22, %v4063_v54  ;;  %v3224_v42 = vpop.f32.mrb[39].mxu0  ;;  %v3256_v62 = vpop.f32.mrb[35].mxu1 }
0x18b5   : > { %v3673_v49 = vpack.c.bf16 %v4174_v17, %v4174_v17  ;;  %v3681_v34 = vpack.c.bf16 %v4175_v7, %v4175_v7  ;;  %v4178_v44 = vadd.high.f32.bf16 %v3224_v42, %v4038_v46  ;;  %v4179_v35 = vadd.high.f32.bf16 %v3256_v62, %v4058_v41  ;;  %v4103_v4 = vpop.permute.xlu1 %4102 }
0x18b6   : > { %3479 = vst.msk [vmem:[%s5019_s16 + $0x8] sm:$0xf] %vm3476_vm13, %v3675_v52  ;;  %3487 = vst.msk [vmem:[%s5019_s16 + $0x28] sm:$0xf] %vm3476_vm13, %v3683_v56  ;;  %v3676_v20 = vpack.c.bf16 %v4176_v47, %v4176_v47  ;;  %v3684_v51 = vpack.c.bf16 %v4177_v40, %v4177_v40 }
0x18b7   : > { %3477 = vst.msk [vmem:[%s5019_s16] sm:$0xf] %vm3476_vm13, %v3673_v49  ;;  %3485 = vst.msk [vmem:[%s5019_s16 + $0x20] sm:$0xf] %vm3476_vm13, %v3681_v34  ;;  %v3674_v53 = vpack.c.bf16 %v4178_v44, %v4178_v44  ;;  %v3682_v32 = vpack.c.bf16 %v4179_v35, %v4179_v35 }
0x18b8   : > { %3480 = vst.msk [vmem:[%s5019_s16 + $0xc] sm:$0xf] %vm3476_vm13, %v3676_v20  ;;  %3488 = vst.msk [vmem:[%s5019_s16 + $0x2c] sm:$0xf] %vm3476_vm13, %v3684_v51 }
0x18b9   : > { %3478 = vst.msk [vmem:[%s5019_s16 + $0x4] sm:$0xf] %vm3476_vm13, %v3674_v53  ;;  %3486 = vst.msk [vmem:[%s5019_s16 + $0x24] sm:$0xf] %vm3476_vm13, %v3682_v32  ;;  %v3977_v10 = vpop.f32.mrb[40].mxu0  ;;  %v3985_v43 = vpop.f32.mrb[36].mxu1 }
0x18ba   : > { %v4180_v33 = vadd.low.f32.bf16 %v3977_v10, %v4053_v48  ;;  %v4181_v6 = vadd.low.f32.bf16 %v3985_v43, %v4073_v39  ;;  %v3237_v37 = vpop.f32.mrb[41].mxu0  ;;  %v3269_v21 = vpop.f32.mrb[37].mxu1 }
0x18bb   : > { %v4182_v8 = vadd.low.f32.bf16 %v3237_v37, %v4048_v12  ;;  %v4183_v15 = vadd.low.f32.bf16 %v3269_v21, %v4068_v14  ;;  %v3978_v59 = vpop.f32.mrb[42].mxu0  ;;  %v3986_v0 = vpop.f32.mrb[38].mxu1 }
0x18bc   : > { %v3679_v28 = vpack.c.bf16 %v4180_v33, %v4180_v33  ;;  %v3687_v45 = vpack.c.bf16 %v4181_v6, %v4181_v6  ;;  %v4184_v2 = vadd.high.f32.bf16 %v3978_v59, %v4053_v48  ;;  %v4185_v25 = vadd.high.f32.bf16 %v3986_v0, %v4073_v39  ;;  %v3240_v18 = vpop.f32.mrb[43].mxu0  ;;  %v3272_v50 = vpop.f32.mrb[39].mxu1 }
0x18bd   : > { %v3677_v57 = vpack.c.bf16 %v4182_v8, %v4182_v8  ;;  %v3685_v30 = vpack.c.bf16 %v4183_v15, %v4183_v15  ;;  %v4186_v27 = vadd.high.f32.bf16 %v3240_v18, %v4048_v12  ;;  %v4187_v61 = vadd.high.f32.bf16 %v3272_v50, %v4068_v14  ;;  %v4088_v12 = vpop.permute.xlu0 %4087  ;;  %v4113_v35 = vpop.permute.xlu1 %4112 }
0x18be   : > { %3483 = vst.msk [vmem:[%s5019_s16 + $0x18] sm:$0xf] %vm3476_vm13, %v3679_v28  ;;  %3491 = vst.msk [vmem:[%s5019_s16 + $0x38] sm:$0xf] %vm3476_vm13, %v3687_v45  ;;  %v3680_v58 = vpack.c.bf16 %v4184_v2, %v4184_v2  ;;  %v3688_v9 = vpack.c.bf16 %v4185_v25, %v4185_v25 }
0x18bf   : > { %3481 = vst.msk [vmem:[%s5019_s16 + $0x10] sm:$0xf] %vm3476_vm13, %v3677_v57  ;;  %3489 = vst.msk [vmem:[%s5019_s16 + $0x30] sm:$0xf] %vm3476_vm13, %v3685_v30  ;;  %v3678_v26 = vpack.c.bf16 %v4186_v27, %v4186_v27  ;;  %v3686_v5 = vpack.c.bf16 %v4187_v61, %v4187_v61 }
0x18c0   : > { %3484 = vst.msk [vmem:[%s5019_s16 + $0x1c] sm:$0xf] %vm3476_vm13, %v3680_v58  ;;  %3492 = vst.msk [vmem:[%s5019_s16 + $0x3c] sm:$0xf] %vm3476_vm13, %v3688_v9 }
0x18c1   : > { %3482 = vst.msk [vmem:[%s5019_s16 + $0x14] sm:$0xf] %vm3476_vm13, %v3678_v26  ;;  %3490 = vst.msk [vmem:[%s5019_s16 + $0x34] sm:$0xf] %vm3476_vm13, %v3686_v5  ;;  %v3989_v31 = vpop.f32.mrb[40].mxu1  ;;  %v4098_v22 = vpop.permute.xlu0 %4097 }
0x18c2   : > { %v4188_v55 = vadd.low.f32.bf16 %v3989_v31, %v4083_v16  ;;  %v3285_v60 = vpop.f32.mrb[41].mxu1 }
0x18c3   : > { %v4189_v36 = vadd.low.f32.bf16 %v3285_v60, %v4078_v1  ;;  %v3990_v38 = vpop.f32.mrb[42].mxu1 }
0x18c4   : > { %v3691_v29 = vpack.c.bf16 %v4188_v55, %v4188_v55  ;;  %v4190_v46 = vadd.high.f32.bf16 %v3990_v38, %v4083_v16  ;;  %v3288_v48 = vpop.f32.mrb[43].mxu1 }
0x18c5   : > { %v3689_v54 = vpack.c.bf16 %v4189_v36, %v4189_v36  ;;  %v4191_v41 = vadd.high.f32.bf16 %v3288_v48, %v4078_v1  ;;  %v4108_v32 = vpop.permute.xlu0 %4107 }
0x18c6   : > { %3495 = vst.msk [vmem:[%s5019_s16 + $0x48] sm:$0xf] %vm3476_vm13, %v3691_v29  ;;  %v3692_v14 = vpack.c.bf16 %v4190_v46, %v4190_v46 }
0x18c7   : > { %3493 = vst.msk [vmem:[%s5019_s16 + $0x40] sm:$0xf] %vm3476_vm13, %v3689_v54  ;;  %v3690_v39 = vpack.c.bf16 %v4191_v41, %v4191_v41 }
0x18c8   : > { %3496 = vst.msk [vmem:[%s5019_s16 + $0x4c] sm:$0xf] %vm3476_vm13, %v3692_v14 }
0x18c9   : > { %3494 = vst.msk [vmem:[%s5019_s16 + $0x44] sm:$0xf] %vm3476_vm13, %v3690_v39  ;;  %v3993_v63 = vpop.f32.mrb[44].mxu1 }
0x18ca   : > { %v4192_v24 = vadd.low.f32.bf16 %v3993_v63, %v4093_v13  ;;  %v3301_v19 = vpop.f32.mrb[45].mxu1 }
0x18cb   : > { %v4193_v11 = vadd.low.f32.bf16 %v3301_v19, %v4088_v12  ;;  %v3994_v3 = vpop.f32.mrb[46].mxu1 }
0x18cc   : > { %v3695_v17 = vpack.c.bf16 %v4192_v24, %v4192_v24  ;;  %v4194_v7 = vadd.high.f32.bf16 %v3994_v3, %v4093_v13  ;;  %v3304_v23 = vpop.f32.mrb[47].mxu1 }
0x18cd   : > { %v3693_v52 = vpack.c.bf16 %v4193_v11, %v4193_v11  ;;  %v4195_v56 = vadd.high.f32.bf16 %v3304_v23, %v4088_v12 }
0x18ce   : > { %3499 = vst.msk [vmem:[%s5019_s16 + $0x58] sm:$0xf] %vm3476_vm13, %v3695_v17  ;;  %v3696_v47 = vpack.c.bf16 %v4194_v7, %v4194_v7 }
0x18cf   : > { %3497 = vst.msk [vmem:[%s5019_s16 + $0x50] sm:$0xf] %vm3476_vm13, %v3693_v52  ;;  %v3694_v40 = vpack.c.bf16 %v4195_v56, %v4195_v56 }
0x18d0   : > { %3500 = vst.msk [vmem:[%s5019_s16 + $0x5c] sm:$0xf] %vm3476_vm13, %v3696_v47 }
0x18d1   : > { %3498 = vst.msk [vmem:[%s5019_s16 + $0x54] sm:$0xf] %vm3476_vm13, %v3694_v40  ;;  %v3997_v42 = vpop.f32.mrb[48].mxu1 }
0x18d2   : > { %v4196_v62 = vadd.low.f32.bf16 %v3997_v42, %v4103_v4  ;;  %v3317_v49 = vpop.f32.mrb[49].mxu1 }
0x18d3   : > { %v4197_v34 = vadd.low.f32.bf16 %v3317_v49, %v4098_v22  ;;  %v3998_v44 = vpop.f32.mrb[50].mxu1 }
0x18d4   : > { %v3699_v20 = vpack.c.bf16 %v4196_v62, %v4196_v62  ;;  %v4198_v51 = vadd.high.f32.bf16 %v3998_v44, %v4103_v4  ;;  %v3320_v53 = vpop.f32.mrb[51].mxu1 }
0x18d5   : > { %v3697_v1 = vpack.c.bf16 %v4197_v34, %v4197_v34  ;;  %v4199_v16 = vadd.high.f32.bf16 %v3320_v53, %v4098_v22 }
0x18d6   : > { %3503 = vst.msk [vmem:[%s5019_s16 + $0x68] sm:$0xf] %vm3476_vm13, %v3699_v20  ;;  %v3700_v10 = vpack.c.bf16 %v4198_v51, %v4198_v51 }
0x18d7   : > { %3501 = vst.msk [vmem:[%s5019_s16 + $0x60] sm:$0xf] %vm3476_vm13, %v3697_v1  ;;  %v3698_v43 = vpack.c.bf16 %v4199_v16, %v4199_v16 }
0x18d8   : > { %3504 = vst.msk [vmem:[%s5019_s16 + $0x6c] sm:$0xf] %vm3476_vm13, %v3700_v10 }
0x18d9   : > { %3502 = vst.msk [vmem:[%s5019_s16 + $0x64] sm:$0xf] %vm3476_vm13, %v3698_v43  ;;  %v4001_v33 = vpop.f32.mrb[52].mxu1 }
0x18da   : > { %v4200_v6 = vadd.low.f32.bf16 %v4001_v33, %v4113_v35  ;;  %v3333_v37 = vpop.f32.mrb[53].mxu1 }
0x18db   : > { %v4201_v21 = vadd.low.f32.bf16 %v3333_v37, %v4108_v32  ;;  %v4002_v8 = vpop.f32.mrb[54].mxu1 }
0x18dc   : > { %v3703_v15 = vpack.c.bf16 %v4200_v6, %v4200_v6  ;;  %v4202_v59 = vadd.high.f32.bf16 %v4002_v8, %v4113_v35  ;;  %v3336_v0 = vpop.f32.mrb[55].mxu1 }
0x18dd   : > { %v3701_v28 = vpack.c.bf16 %v4201_v21, %v4201_v21  ;;  %v4203_v45 = vadd.high.f32.bf16 %v3336_v0, %v4108_v32 }
0x18de   : > { %3507 = vst.msk [vmem:[%s5019_s16 + $0x78] sm:$0xf] %vm3476_vm13, %v3703_v15  ;;  %v3704_v2 = vpack.c.bf16 %v4202_v59, %v4202_v59 }
0x18df   : > { %3505 = vst.msk [vmem:[%s5019_s16 + $0x70] sm:$0xf] %vm3476_vm13, %v3701_v28  ;;  %v3702_v25 = vpack.c.bf16 %v4203_v45, %v4203_v45 }
0x18e0   : > { %3508 = vst.msk [vmem:[%s5019_s16 + $0x7c] sm:$0xf] %vm3476_vm13, %v3704_v2 }
0x18e1   : > { %3506 = vst.msk [vmem:[%s5019_s16 + $0x74] sm:$0xf] %vm3476_vm13, %v3702_v25 }
0x18e2 PF: > { %s11_s6 = sadd.s32 1, %s4210_s6  }
0x18e3   : > { %p8_p4 = scmp.ge.s32.totalorder %s11_s6, 4  }
0x18e5   :  { %10 = sbr.rel (!%p8_p4) target bundleno = 1 (0x1), region = 54 }

</bundles_post_ra>
